<compile_context>
chip_gen: v5e
topology: v5e:2x2
jax: 0.10.0
libtpu: 0.0.40
codegen_flags: <defaults>
</compile_context>

<pallas_src>
import jax
import jax.numpy as jnp
from jax.experimental import pallas as pl
from jax.experimental.pallas import tpu as pltpu

# ----------------- config: small, structurally faithful whisper-tiny ---------
B = 2            # batch
N_MELS = 16      # mel channels      (whisper-tiny: 80)
T_IN = 16        # input frames      (whisper-tiny: 3000)
D_MODEL = 64     # hidden size       (whisper-tiny: 384)
N_HEADS = 2      # attention heads   (whisper-tiny: 6)
N_LAYERS = 2     # encoder layers    (whisper-tiny: 4)
D_FFN = 4 * D_MODEL
D_HEAD = D_MODEL // N_HEADS
T_ENC = (T_IN + 2 - 3) // 2 + 1      # conv2 (k=3, s=2, p=1) output length
BT = B * T_ENC
LN_EPS = 1e-5
ATT_SCALE = float(D_HEAD) ** -0.5

_VMEM = pl.BlockSpec(memory_space=pltpu.MemorySpace.VMEM)


# ----------------------------- in-kernel helpers ------------------------------
def _gelu(x):
    # TODO(synk): HF Whisper uses exact erf-GELU; tanh approximation used here
    # for guaranteed Mosaic lowering (EUP tanh).
    c = 0.7978845608028654  # sqrt(2/pi)
    return 0.5 * x * (1.0 + jnp.tanh(c * (x + 0.044715 * x * x * x)))


def _layernorm(x, g, b):
    mean = jnp.mean(x, axis=-1, keepdims=True)
    xc = x - mean
    var = jnp.mean(xc * xc, axis=-1, keepdims=True)
    return xc * jax.lax.rsqrt(var + LN_EPS) * g + b


# ------------------- kernel 1: conv1 as fused im2col matmul -------------------
def conv1_kernel(p_ref, w_ref, b_ref, o_ref):
    acc = jnp.dot(p_ref[...].astype(jnp.bfloat16), w_ref[...],
                  preferred_element_type=jnp.float32) + b_ref[...]
    o_ref[...] = _gelu(acc)


def conv1(patches, w, b):
    m = patches.shape[0]
    n = w.shape[1]
    return pl.pallas_call(
        conv1_kernel,
        out_shape=jax.ShapeDtypeStruct((m, n), jnp.float32),
        in_specs=[_VMEM, _VMEM, _VMEM],
        out_specs=_VMEM,
    )(patches, w, b)


# -------- kernel 2: conv2 epilogue + full encoder + head, one pallas_call -----
def encoder_kernel(p2_ref, c2w_ref, c2b_ref, pos_ref,
                   ln1_g_ref, ln1_b_ref, wqkv_ref, bqkv_ref, wo_ref, bo_ref,
                   ln2_g_ref, ln2_b_ref, w1_ref, b1_ref, w2_ref, b2_ref,
                   lnf_g_ref, lnf_b_ref, fcw_ref, fcb_ref,
                   out_ref, x_sc):
    layer = pl.program_id(0)

    # Layer 0: finish the conv stem (conv2 matmul + bias + GELU + pos-emb) in
    # VMEM and seed the residual-stream scratch.  Also zero the (resident)
    # output block so its eventual writeback is deterministic.
    @pl.when(layer == 0)
    def _():
        acc = jnp.dot(p2_ref[...].astype(jnp.bfloat16), c2w_ref[...],
                      preferred_element_type=jnp.float32) + c2b_ref[...]
        x_sc[...] = _gelu(acc) + pos_ref[...]
        out_ref[...] = jnp.zeros_like(out_ref)

    x = x_sc[...]                                             # (BT, D) f32

    # ---- self-attention block (pre-norm), fused QKV projection ----
    h = _layernorm(x, ln1_g_ref[0], ln1_b_ref[0])
    qkv = jnp.dot(h.astype(jnp.bfloat16), wqkv_ref[0],
                  preferred_element_type=jnp.float32) + bqkv_ref[0]  # (BT, 3D)

    # Pre-scale all heads' q once (HF Whisper scales q after q_proj).
    q_all = qkv[:, :D_MODEL] * ATT_SCALE                      # (BT, D)

    heads = []
    for hd in range(N_HEADS):                      # static unroll; TODO(synk):
        # flash-style KV tiling needed at real Whisper T (~1500).
        q = q_all[:, hd * D_HEAD:(hd + 1) * D_HEAD]
        k = qkv[:, D_MODEL + hd * D_HEAD:D_MODEL + (hd + 1) * D_HEAD]
        v = qkv[:, 2 * D_MODEL + hd * D_HEAD:2 * D_MODEL + (hd + 1) * D_HEAD]
        qh = q.reshape(B, T_ENC, D_HEAD).astype(jnp.bfloat16)
        kh = k.reshape(B, T_ENC, D_HEAD).astype(jnp.bfloat16)
        vh = v.reshape(B, T_ENC, D_HEAD).astype(jnp.bfloat16)
        s = jnp.einsum("bqd,bkd->bqk", qh, kh,
                       preferred_element_type=jnp.float32)
        m = jnp.max(s, axis=-1, keepdims=True)
        p = jnp.exp(s - m)
        p = p * pl.reciprocal(jnp.sum(p, axis=-1, keepdims=True), approx=True)
        oh = jnp.einsum("bqk,bkd->bqd", p.astype(jnp.bfloat16), vh,
                        preferred_element_type=jnp.float32)
        heads.append(oh.reshape(BT, D_HEAD))
    attn = jnp.concatenate(heads, axis=-1)                    # (BT, D)

    o = jnp.dot(attn.astype(jnp.bfloat16), wo_ref[0],
                preferred_element_type=jnp.float32) + bo_ref[0]
    x = x + o                                                 # fused residual

    # ---- MLP block (pre-norm) ----
    h = _layernorm(x, ln2_g_ref[0], ln2_b_ref[0])
    h = _gelu(jnp.dot(h.astype(jnp.bfloat16), w1_ref[0],
                      preferred_element_type=jnp.float32) + b1_ref[0])
    h = jnp.dot(h.astype(jnp.bfloat16), w2_ref[0],
                preferred_element_type=jnp.float32) + b2_ref[0]
    x = x + h                                                 # fused residual
    x_sc[...] = x                                             # stays in VMEM

    # ---- last layer: final LN + mean-pool over time + fc + sigmoid ----
    @pl.when(layer == pl.num_programs(0) - 1)
    def _():
        xf = _layernorm(x, lnf_g_ref[...], lnf_b_ref[...])     # (BT, D)
        pooled = jnp.sum(xf.reshape(B, T_ENC, D_MODEL), axis=1) * (1.0 / T_ENC)
        # fc as VPU multiply + lane reduce (avoid an N=1 MXU pass).
        logits = jnp.sum(pooled * fcw_ref[...], axis=-1, keepdims=True) \
            + fcb_ref[...]
        out_ref[...] = 1.0 / (1.0 + jnp.exp(-logits))


def encoder_forward(p2, params):
    def layer_spec(r, c):
        return pl.BlockSpec((1, r, c), lambda l: (l, 0, 0))

    def fixed_spec(shape):
        nd = len(shape)
        return pl.BlockSpec(shape, lambda l: (0,) * nd)

    in_specs = [
        fixed_spec((BT, 3 * D_MODEL)),       # conv2 im2col patches
        fixed_spec((3 * D_MODEL, D_MODEL)),  # conv2 weight (flattened, bf16)
        fixed_spec((1, D_MODEL)),            # conv2 bias
        fixed_spec((BT, D_MODEL)),           # pos-emb (pre-tiled over batch)
        layer_spec(1, D_MODEL),              # ln1_g
        layer_spec(1, D_MODEL),              # ln1_b
        layer_spec(D_MODEL, 3 * D_MODEL),    # wqkv (fused q|k|v, bf16)
        layer_spec(1, 3 * D_MODEL),          # bqkv (k bias = 0)
        layer_spec(D_MODEL, D_MODEL),        # wo
        layer_spec(1, D_MODEL),              # bo
        layer_spec(1, D_MODEL),              # ln2_g
        layer_spec(1, D_MODEL),              # ln2_b
        layer_spec(D_MODEL, D_FFN),          # w1
        layer_spec(1, D_FFN),                # b1
        layer_spec(D_FFN, D_MODEL),          # w2
        layer_spec(1, D_MODEL),              # b2
        fixed_spec((1, D_MODEL)),            # lnf_g
        fixed_spec((1, D_MODEL)),            # lnf_b
        fixed_spec((1, D_MODEL)),            # fc_w
        fixed_spec((1, 1)),                  # fc_b
    ]
    grid_spec = pltpu.PrefetchScalarGridSpec(
        num_scalar_prefetch=0,
        grid=(N_LAYERS,),
        in_specs=in_specs,
        out_specs=pl.BlockSpec((B, 1), lambda l: (0, 0)),
        scratch_shapes=[pltpu.VMEM((BT, D_MODEL), jnp.float32)],
    )
    return pl.pallas_call(
        encoder_kernel,
        out_shape=jax.ShapeDtypeStruct((B, 1), jnp.float32),
        grid_spec=grid_spec,
        compiler_params=pltpu.CompilerParams(
            dimension_semantics=("arbitrary",),
            vmem_limit_bytes=64 * 1024 * 1024,
        ),
    )(
        p2,
        params["conv2_wf"], params["conv2_b"], params["pos_emb"],
        params["ln1_g"], params["ln1_b"],
        params["wqkv"], params["bqkv"],
        params["wo"], params["bo"],
        params["ln2_g"], params["ln2_b"],
        params["w1"], params["b1"],
        params["w2"], params["b2"],
        params["lnf_g"], params["lnf_b"],
        params["fc_w"], params["fc_b"],
    )


# ----------------------------- JAX glue ---------------------------------------
def forward(input_features, params):
    bsz, c, t = input_features.shape

    # conv1 im2col (XLA glue) -> fused Pallas matmul + bias + GELU.
    # TODO(synk): at real Whisper scale move im2col inside Pallas (3 shifted
    # strided-ds matmuls) to avoid materializing the 3x patch copy in HBM.
    xp = jnp.pad(input_features, ((0, 0), (0, 0), (1, 1)))
    p1 = jnp.stack([xp[:, :, k:k + t] for k in range(3)], axis=-1)
    p1 = p1.transpose(0, 2, 1, 3).reshape(bsz * t, c * 3)
    h1 = conv1(p1, params["conv1_wf"], params["conv1_b"])      # (B*T_IN, D)

    # conv2 im2col (stride 2); the matmul/GELU/pos-emb happen inside the fused
    # encoder kernel at layer 0.
    h1 = h1.reshape(bsz, t, D_MODEL)
    hp = jnp.pad(h1, ((0, 0), (1, 1), (0, 0)))
    t_enc = (t + 2 - 3) // 2 + 1
    p2 = jnp.stack(
        [hp[:, k:k + 2 * (t_enc - 1) + 1:2, :] for k in range(3)], axis=-1)
    p2 = p2.reshape(bsz * t_enc, D_MODEL * 3)

    return encoder_forward(p2, params)


def sinusoids(length, channels):
    half = channels // 2
    log_inc = jnp.log(10000.0) / (half - 1)
    inv = jnp.exp(-log_inc * jnp.arange(half, dtype=jnp.float32))
    t = jnp.arange(length, dtype=jnp.float32)[:, None] * inv[None, :]
    return jnp.concatenate([jnp.sin(t), jnp.cos(t)], axis=1)


def init_params(key):
    keys = iter(jax.random.split(key, 32))

    def nrm(shape, scale=0.02):
        return scale * jax.random.normal(next(keys), shape, jnp.float32)

    L = N_LAYERS
    # PyTorch Conv1d weight layout (D_out, C_in, K), flattened for im2col matmul.
    conv1_w = nrm((D_MODEL, N_MELS, 3))
    conv2_w = nrm((D_MODEL, D_MODEL, 3))

    wq = nrm((L, D_MODEL, D_MODEL))
    wk = nrm((L, D_MODEL, D_MODEL))
    wv = nrm((L, D_MODEL, D_MODEL))
    bq = nrm((L, 1, D_MODEL))
    bk = jnp.zeros((L, 1, D_MODEL), jnp.float32)   # whisper k_proj has no bias
    bv = nrm((L, 1, D_MODEL))

    return {
        "conv1_wf": conv1_w.transpose(1, 2, 0)
                           .reshape(N_MELS * 3, D_MODEL).astype(jnp.bfloat16),
        "conv1_b": nrm((1, D_MODEL)),
        "conv2_wf": conv2_w.transpose(1, 2, 0)
                           .reshape(D_MODEL * 3, D_MODEL).astype(jnp.bfloat16),
        "conv2_b": nrm((1, D_MODEL)),
        "pos_emb": jnp.tile(sinusoids(T_ENC, D_MODEL), (B, 1)),  # (B*T_ENC, D)
        "ln1_g": jnp.ones((L, 1, D_MODEL), jnp.float32),
        "ln1_b": jnp.zeros((L, 1, D_MODEL), jnp.float32),
        "wqkv": jnp.concatenate([wq, wk, wv], axis=-1).astype(jnp.bfloat16),
        "bqkv": jnp.concatenate([bq, bk, bv], axis=-1),
        "wo": nrm((L, D_MODEL, D_MODEL)).astype(jnp.bfloat16),
        "bo": nrm((L, 1, D_MODEL)),
        "ln2_g": jnp.ones((L, 1, D_MODEL), jnp.float32),
        "ln2_b": jnp.zeros((L, 1, D_MODEL), jnp.float32),
        "w1": nrm((L, D_MODEL, D_FFN)).astype(jnp.bfloat16),
        "b1": nrm((L, 1, D_FFN)),
        "w2": nrm((L, D_FFN, D_MODEL)).astype(jnp.bfloat16),
        "b2": nrm((L, 1, D_MODEL)),
        "lnf_g": jnp.ones((1, D_MODEL), jnp.float32),
        "lnf_b": jnp.zeros((1, D_MODEL), jnp.float32),
        "fc_w": nrm((1, D_MODEL)),
        "fc_b": jnp.zeros((1, 1), jnp.float32),
    }


if __name__ == "__main__":
    key = jax.random.PRNGKey(0)
    k_in, k_par = jax.random.split(key)
    input_features = jax.random.normal(k_in, (B, N_MELS, T_IN), jnp.float32)
    params = init_params(k_par)

    fwd = jax.jit(forward)
    out = jax.block_until_ready(fwd(input_features, params))
    assert out.shape == (B, 1) and out.dtype == jnp.float32
    assert bool(jnp.all((out >= 0.0) & (out <= 1.0)))
    print("KERNEL_OK")
</pallas_src>

<mosaic_0001>
module attributes {stable_mosaic.version = 11 : i64} {
  func.func @conv1_kernel(%arg0: memref<32x48xf32, #tpu.memory_space<vmem>>, %arg1: memref<48x64xbf16, #tpu.memory_space<vmem>>, %arg2: memref<1x64xf32, #tpu.memory_space<vmem>>, %arg3: memref<32x64xf32, #tpu.memory_space<vmem>>) attributes {dimension_semantics = [], scalar_prefetch = 0 : i64, scratch_operands = 0 : i64, tpu.core_type = #tpu.core_type<tc>} {
    %c0 = arith.constant 0 : index
    %c0_0 = arith.constant 0 : index
    %0 = vector.load %arg0[%c0, %c0_0] : memref<32x48xf32, #tpu.memory_space<vmem>>, vector<32x48xf32>
    %1 = arith.truncf %0 : vector<32x48xf32> to vector<32x48xbf16>
    %c0_1 = arith.constant 0 : index
    %c0_2 = arith.constant 0 : index
    %2 = vector.load %arg1[%c0_1, %c0_2] : memref<48x64xbf16, #tpu.memory_space<vmem>>, vector<48x64xbf16>
    %cst = arith.constant dense<0.000000e+00> : vector<32x64xf32>
    %3 = tpu.matmul %1, %2, %cst {dimension_numbers = #tpu.dot_dimension_numbers<[1], [0], [0], [1], [0, 0, 1, 1], [], []>} : vector<32x48xbf16>, vector<48x64xbf16>, vector<32x64xf32> -> vector<32x64xf32>
    %c0_3 = arith.constant 0 : index
    %c0_4 = arith.constant 0 : index
    %4 = vector.load %arg2[%c0_3, %c0_4] : memref<1x64xf32, #tpu.memory_space<vmem>>, vector<1x64xf32>
    %5 = vector.broadcast %4 : vector<1x64xf32> to vector<32x64xf32>
    %6 = arith.addf %3, %5 : vector<32x64xf32>
    %cst_5 = arith.constant 5.000000e-01 : f32
    %7 = vector.broadcast %cst_5 : f32 to vector<32x64xf32>
    %8 = arith.mulf %7, %6 : vector<32x64xf32>
    %cst_6 = arith.constant 4.471500e-02 : f32
    %9 = vector.broadcast %cst_6 : f32 to vector<32x64xf32>
    %10 = arith.mulf %9, %6 : vector<32x64xf32>
    %11 = arith.mulf %10, %6 : vector<32x64xf32>
    %12 = arith.mulf %11, %6 : vector<32x64xf32>
    %13 = arith.addf %6, %12 : vector<32x64xf32>
    %cst_7 = arith.constant 0.797884583 : f32
    %14 = vector.broadcast %cst_7 : f32 to vector<32x64xf32>
    %15 = arith.mulf %14, %13 : vector<32x64xf32>
    %16 = math.tanh %15 : vector<32x64xf32>
    %cst_8 = arith.constant 1.000000e+00 : f32
    %17 = vector.broadcast %cst_8 : f32 to vector<32x64xf32>
    %18 = arith.addf %17, %16 : vector<32x64xf32>
    %19 = arith.mulf %8, %18 : vector<32x64xf32>
    %c0_9 = arith.constant 0 : index
    %c0_10 = arith.constant 0 : index
    %20 = vector.load %arg3[%c0_9, %c0_10] : memref<32x64xf32, #tpu.memory_space<vmem>>, vector<32x64xf32>
    tpu.vector_store %arg3[%c0_9, %c0_10], %19 {strides = array<i32>} : memref<32x64xf32, #tpu.memory_space<vmem>>, vector<32x64xf32>,
    return
  }
}

module attributes {stable_mosaic.version = 11 : i64} {
  func.func @encoder_kernel(%arg0: i32, %arg1: memref<16x192xf32, #tpu.memory_space<vmem>>, %arg2: memref<192x64xbf16, #tpu.memory_space<vmem>>, %arg3: memref<1x64xf32, #tpu.memory_space<vmem>>, %arg4: memref<16x64xf32, #tpu.memory_space<vmem>>, %arg5: memref<1x1x64xf32, #tpu.memory_space<vmem>>, %arg6: memref<1x1x64xf32, #tpu.memory_space<vmem>>, %arg7: memref<1x64x192xbf16, #tpu.memory_space<vmem>>, %arg8: memref<1x1x192xf32, #tpu.memory_space<vmem>>, %arg9: memref<1x64x64xbf16, #tpu.memory_space<vmem>>, %arg10: memref<1x1x64xf32, #tpu.memory_space<vmem>>, %arg11: memref<1x1x64xf32, #tpu.memory_space<vmem>>, %arg12: memref<1x1x64xf32, #tpu.memory_space<vmem>>, %arg13: memref<1x64x256xbf16, #tpu.memory_space<vmem>>, %arg14: memref<1x1x256xf32, #tpu.memory_space<vmem>>, %arg15: memref<1x256x64xbf16, #tpu.memory_space<vmem>>, %arg16: memref<1x1x64xf32, #tpu.memory_space<vmem>>, %arg17: memref<1x64xf32, #tpu.memory_space<vmem>>, %arg18: memref<1x64xf32, #tpu.memory_space<vmem>>, %arg19: memref<1x64xf32, #tpu.memory_space<vmem>>, %arg20: memref<1x1xf32, #tpu.memory_space<vmem>>, %arg21: memref<2x1xf32, #tpu.memory_space<vmem>>, %arg22: memref<16x64xf32, #tpu.memory_space<vmem>>) attributes {dimension_semantics = [#tpu.dimension_semantics<arbitrary>], iteration_bounds = array<i64: 2>, scalar_prefetch = 0 : i64, scratch_operands = 1 : i64, tpu.core_type = #tpu.core_type<tc>, window_params = [{pipeline_mode = #tpu.pipeline_mode<synchronous>, transform_indices = @transform_0, window_bounds = array<i64: 16, 192>}, {pipeline_mode = #tpu.pipeline_mode<synchronous>, transform_indices = @transform_1, window_bounds = array<i64: 192, 64>}, {pipeline_mode = #tpu.pipeline_mode<synchronous>, transform_indices = @transform_2, window_bounds = array<i64: 1, 64>}, {pipeline_mode = #tpu.pipeline_mode<synchronous>, transform_indices = @transform_3, window_bounds = array<i64: 16, 64>}, {transform_indices = @transform_4, window_bounds = array<i64: 1, 1, 64>}, {transform_indices = @transform_5, window_bounds = array<i64: 1, 1, 64>}, {transform_indices = @transform_6, window_bounds = array<i64: 1, 64, 192>}, {transform_indices = @transform_7, window_bounds = array<i64: 1, 1, 192>}, {transform_indices = @transform_8, window_bounds = array<i64: 1, 64, 64>}, {transform_indices = @transform_9, window_bounds = array<i64: 1, 1, 64>}, {transform_indices = @transform_10, window_bounds = array<i64: 1, 1, 64>}, {transform_indices = @transform_11, window_bounds = array<i64: 1, 1, 64>}, {transform_indices = @transform_12, window_bounds = array<i64: 1, 64, 256>}, {transform_indices = @transform_13, window_bounds = array<i64: 1, 1, 256>}, {transform_indices = @transform_14, window_bounds = array<i64: 1, 256, 64>}, {transform_indices = @transform_15, window_bounds = array<i64: 1, 1, 64>}, {pipeline_mode = #tpu.pipeline_mode<synchronous>, transform_indices = @transform_16, window_bounds = array<i64: 1, 64>}, {pipeline_mode = #tpu.pipeline_mode<synchronous>, transform_indices = @transform_17, window_bounds = array<i64: 1, 64>}, {pipeline_mode = #tpu.pipeline_mode<synchronous>, transform_indices = @transform_18, window_bounds = array<i64: 1, 64>}, {pipeline_mode = #tpu.pipeline_mode<synchronous>, transform_indices = @transform_19, window_bounds = array<i64: 1, 1>}, {pipeline_mode = #tpu.pipeline_mode<synchronous>, transform_indices = @transform_20, window_bounds = array<i64: 2, 1>}]} {
    %c0_i32 = arith.constant 0 : i32
    %0 = arith.cmpi eq, %arg0, %c0_i32 : i32
    %1 = arith.extui %0 : i1 to i32
    %c0_i32_0 = arith.constant 0 : i32
    %2 = arith.cmpi ne, %1, %c0_i32_0 : i32
    scf.if %2 {
      %c0_67 = arith.constant 0 : index
      %c0_68 = arith.constant 0 : index
      %153 = vector.load %arg1[%c0_67, %c0_68] : memref<16x192xf32, #tpu.memory_space<vmem>>, vector<16x192xf32>
      %154 = arith.truncf %153 : vector<16x192xf32> to vector<16x192xbf16>
      %c0_69 = arith.constant 0 : index
      %c0_70 = arith.constant 0 : index
      %155 = vector.load %arg2[%c0_69, %c0_70] : memref<192x64xbf16, #tpu.memory_space<vmem>>, vector<192x64xbf16>
      %cst_71 = arith.constant dense<0.000000e+00> : vector<16x64xf32>
      %156 = tpu.matmul %154, %155, %cst_71 {dimension_numbers = #tpu.dot_dimension_numbers<[1], [0], [0], [1], [0, 0, 1, 1], [], []>} : vector<16x192xbf16>, vector<192x64xbf16>, vector<16x64xf32> -> vector<16x64xf32>
      %c0_72 = arith.constant 0 : index
      %c0_73 = arith.constant 0 : index
      %157 = vector.load %arg3[%c0_72, %c0_73] : memref<1x64xf32, #tpu.memory_space<vmem>>, vector<1x64xf32>
      %158 = vector.broadcast %157 : vector<1x64xf32> to vector<16x64xf32>
      %159 = arith.addf %156, %158 : vector<16x64xf32>
      %cst_74 = arith.constant 5.000000e-01 : f32
      %160 = vector.broadcast %cst_74 : f32 to vector<16x64xf32>
      %161 = arith.mulf %160, %159 : vector<16x64xf32>
      %cst_75 = arith.constant 4.471500e-02 : f32
      %162 = vector.broadcast %cst_75 : f32 to vector<16x64xf32>
      %163 = arith.mulf %162, %159 : vector<16x64xf32>
      %164 = arith.mulf %163, %159 : vector<16x64xf32>
      %165 = arith.mulf %164, %159 : vector<16x64xf32>
      %166 = arith.addf %159, %165 : vector<16x64xf32>
      %cst_76 = arith.constant 0.797884583 : f32
      %167 = vector.broadcast %cst_76 : f32 to vector<16x64xf32>
      %168 = arith.mulf %167, %166 : vector<16x64xf32>
      %169 = math.tanh %168 : vector<16x64xf32>
      %cst_77 = arith.constant 1.000000e+00 : f32
      %170 = vector.broadcast %cst_77 : f32 to vector<16x64xf32>
      %171 = arith.addf %170, %169 : vector<16x64xf32>
      %172 = arith.mulf %161, %171 : vector<16x64xf32>
      %c0_78 = arith.constant 0 : index
      %c0_79 = arith.constant 0 : index
      %173 = vector.load %arg4[%c0_78, %c0_79] : memref<16x64xf32, #tpu.memory_space<vmem>>, vector<16x64xf32>
      %174 = arith.addf %172, %173 : vector<16x64xf32>
      %c0_80 = arith.constant 0 : index
      %c0_81 = arith.constant 0 : index
      %175 = vector.load %arg22[%c0_80, %c0_81] : memref<16x64xf32, #tpu.memory_space<vmem>>, vector<16x64xf32>
      tpu.vector_store %arg22[%c0_80, %c0_81], %174 {strides = array<i32>} : memref<16x64xf32, #tpu.memory_space<vmem>>, vector<16x64xf32>,
      %cst_82 = arith.constant 0.000000e+00 : f32
      %176 = vector.broadcast %cst_82 : f32 to vector<2x1xf32>
      %c0_83 = arith.constant 0 : index
      %c0_84 = arith.constant 0 : index
      %177 = vector.load %arg21[%c0_83, %c0_84] : memref<2x1xf32, #tpu.memory_space<vmem>>, vector<2x1xf32>
      tpu.vector_store %arg21[%c0_83, %c0_84], %176 {strides = array<i32>} : memref<2x1xf32, #tpu.memory_space<vmem>>, vector<2x1xf32>,
    } else {
    }
    %c0 = arith.constant 0 : index
    %c0_1 = arith.constant 0 : index
    %3 = vector.load %arg22[%c0, %c0_1] : memref<16x64xf32, #tpu.memory_space<vmem>>, vector<16x64xf32>
    %c0_2 = arith.constant 0 : index
    %c0_3 = arith.constant 0 : index
    %c0_4 = arith.constant 0 : index
    %4 = vector.load %arg5[%c0_2, %c0_3, %c0_4] : memref<1x1x64xf32, #tpu.memory_space<vmem>>, vector<1x1x64xf32>
    %5 = vector.shape_cast %4 : vector<1x1x64xf32> to vector<1x64xf32>
    %c0_5 = arith.constant 0 : index
    %c0_6 = arith.constant 0 : index
    %c0_7 = arith.constant 0 : index
    %6 = vector.load %arg6[%c0_5, %c0_6, %c0_7] : memref<1x1x64xf32, #tpu.memory_space<vmem>>, vector<1x1x64xf32>
    %7 = vector.shape_cast %6 : vector<1x1x64xf32> to vector<1x64xf32>
    %cst = arith.constant dense<0.000000e+00> : vector<16xf32>
    %8 = vector.multi_reduction <add>, %3, %cst [1] : vector<16x64xf32> to vector<16xf32>
    %9 = vector.shape_cast %8 : vector<16xf32> to vector<16x1xf32>
    %cst_8 = arith.constant 6.400000e+01 : f32
    %10 = vector.broadcast %cst_8 : f32 to vector<16x1xf32>
    %11 = arith.divf %9, %10 : vector<16x1xf32>
    %12 = vector.broadcast %11 : vector<16x1xf32> to vector<16x64xf32>
    %13 = arith.subf %3, %12 : vector<16x64xf32>
    %14 = arith.mulf %13, %13 : vector<16x64xf32>
    %cst_9 = arith.constant dense<0.000000e+00> : vector<16xf32>
    %15 = vector.multi_reduction <add>, %14, %cst_9 [1] : vector<16x64xf32> to vector<16xf32>
    %16 = vector.shape_cast %15 : vector<16xf32> to vector<16x1xf32>
    %cst_10 = arith.constant 6.400000e+01 : f32
    %17 = vector.broadcast %cst_10 : f32 to vector<16x1xf32>
    %18 = arith.divf %16, %17 : vector<16x1xf32>
    %cst_11 = arith.constant 9.99999974E-6 : f32
    %19 = vector.broadcast %cst_11 : f32 to vector<16x1xf32>
    %20 = arith.addf %18, %19 : vector<16x1xf32>
    %21 = math.rsqrt %20 : vector<16x1xf32>
    %22 = vector.broadcast %21 : vector<16x1xf32> to vector<16x64xf32>
    %23 = arith.mulf %13, %22 : vector<16x64xf32>
    %24 = vector.broadcast %5 : vector<1x64xf32> to vector<16x64xf32>
    %25 = arith.mulf %23, %24 : vector<16x64xf32>
    %26 = vector.broadcast %7 : vector<1x64xf32> to vector<16x64xf32>
    %27 = arith.addf %25, %26 : vector<16x64xf32>
    %28 = arith.truncf %27 : vector<16x64xf32> to vector<16x64xbf16>
    %c0_12 = arith.constant 0 : index
    %c0_13 = arith.constant 0 : index
    %c0_14 = arith.constant 0 : index
    %29 = vector.load %arg7[%c0_12, %c0_13, %c0_14] : memref<1x64x192xbf16, #tpu.memory_space<vmem>>, vector<1x64x192xbf16>
    %30 = vector.shape_cast %29 : vector<1x64x192xbf16> to vector<64x192xbf16>
    %cst_15 = arith.constant dense<0.000000e+00> : vector<16x192xf32>
    %31 = tpu.matmul %28, %30, %cst_15 {dimension_numbers = #tpu.dot_dimension_numbers<[1], [0], [0], [1], [0, 0, 1, 1], [], []>} : vector<16x64xbf16>, vector<64x192xbf16>, vector<16x192xf32> -> vector<16x192xf32>
    %c0_16 = arith.constant 0 : index
    %c0_17 = arith.constant 0 : index
    %c0_18 = arith.constant 0 : index
    %32 = vector.load %arg8[%c0_16, %c0_17, %c0_18] : memref<1x1x192xf32, #tpu.memory_space<vmem>>, vector<1x1x192xf32>
    %33 = vector.shape_cast %32 : vector<1x1x192xf32> to vector<1x192xf32>
    %34 = vector.broadcast %33 : vector<1x192xf32> to vector<16x192xf32>
    %35 = arith.addf %31, %34 : vector<16x192xf32>
    %36 = vector.extract_strided_slice %35 {offsets = [0, 0], sizes = [16, 64], strides = [1, 1]} : vector<16x192xf32> to vector<16x64xf32>
    %cst_19 = arith.constant 0.176776692 : f32
    %37 = vector.broadcast %cst_19 : f32 to vector<16x64xf32>
    %38 = arith.mulf %36, %37 : vector<16x64xf32>
    %39 = vector.extract_strided_slice %38 {offsets = [0, 0], sizes = [16, 32], strides = [1, 1]} : vector<16x64xf32> to vector<16x32xf32>
    %40 = vector.extract_strided_slice %35 {offsets = [0, 64], sizes = [16, 32], strides = [1, 1]} : vector<16x192xf32> to vector<16x32xf32>
    %41 = vector.extract_strided_slice %35 {offsets = [0, 128], sizes = [16, 32], strides = [1, 1]} : vector<16x192xf32> to vector<16x32xf32>
    %42 = vector.shape_cast %39 : vector<16x32xf32> to vector<2x8x32xf32>
    %43 = arith.truncf %42 : vector<2x8x32xf32> to vector<2x8x32xbf16>
    %44 = vector.shape_cast %40 : vector<16x32xf32> to vector<2x8x32xf32>
    %45 = arith.truncf %44 : vector<2x8x32xf32> to vector<2x8x32xbf16>
    %46 = vector.shape_cast %41 : vector<16x32xf32> to vector<2x8x32xf32>
    %47 = arith.truncf %46 : vector<2x8x32xf32> to vector<2x8x32xbf16>
    "tpu.trace_start"() <{level = 10 : i32, message = "bqd,bkd->bqk"}> : () -> ()
    %cst_20 = arith.constant dense<0.000000e+00> : vector<2x8x8xf32>
    %48 = tpu.matmul %43, %45, %cst_20 {dimension_numbers = #tpu.dot_dimension_numbers<[2], [2], [1], [1], [0, 0, 0, 1, 1, 1], [0], [0]>} : vector<2x8x32xbf16>, vector<2x8x32xbf16>, vector<2x8x8xf32> -> vector<2x8x8xf32>
    "tpu.trace_stop"() : () -> ()
    %cst_21 = arith.constant dense<0xFF800000> : vector<2x8xf32>
    %49 = vector.multi_reduction <maximumf>, %48, %cst_21 [2] : vector<2x8x8xf32> to vector<2x8xf32>
    %50 = vector.shape_cast %49 : vector<2x8xf32> to vector<2x8x1xf32>
    %51 = vector.broadcast %50 : vector<2x8x1xf32> to vector<2x8x8xf32>
    %52 = arith.subf %48, %51 : vector<2x8x8xf32>
    %53 = math.exp %52 : vector<2x8x8xf32>
    %cst_22 = arith.constant dense<0.000000e+00> : vector<2x8xf32>
    %54 = vector.multi_reduction <add>, %53, %cst_22 [2] : vector<2x8x8xf32> to vector<2x8xf32>
    %55 = vector.shape_cast %54 : vector<2x8xf32> to vector<2x8x1xf32>
    %56 = tpu.reciprocal %55 {approx = true} : vector<2x8x1xf32> -> vector<2x8x1xf32>
    %57 = vector.broadcast %56 : vector<2x8x1xf32> to vector<2x8x8xf32>
    %58 = arith.mulf %53, %57 : vector<2x8x8xf32>
    %59 = arith.truncf %58 : vector<2x8x8xf32> to vector<2x8x8xbf16>
    "tpu.trace_start"() <{level = 10 : i32, message = "bqk,bkd->bqd"}> : () -> ()
    %cst_23 = arith.constant dense<0.000000e+00> : vector<2x8x32xf32>
    %60 = tpu.matmul %59, %47, %cst_23 {dimension_numbers = #tpu.dot_dimension_numbers<[2], [1], [1], [2], [0, 0, 0, 1, 1, 2], [0], [0]>} : vector<2x8x8xbf16>, vector<2x8x32xbf16>, vector<2x8x32xf32> -> vector<2x8x32xf32>
    "tpu.trace_stop"() : () -> ()
    %61 = vector.shape_cast %60 : vector<2x8x32xf32> to vector<16x32xf32>
    %62 = vector.extract_strided_slice %38 {offsets = [0, 32], sizes = [16, 32], strides = [1, 1]} : vector<16x64xf32> to vector<16x32xf32>
    %63 = vector.extract_strided_slice %35 {offsets = [0, 96], sizes = [16, 32], strides = [1, 1]} : vector<16x192xf32> to vector<16x32xf32>
    %64 = vector.extract_strided_slice %35 {offsets = [0, 160], sizes = [16, 32], strides = [1, 1]} : vector<16x192xf32> to vector<16x32xf32>
    %65 = vector.shape_cast %62 : vector<16x32xf32> to vector<2x8x32xf32>
    %66 = arith.truncf %65 : vector<2x8x32xf32> to vector<2x8x32xbf16>
    %67 = vector.shape_cast %63 : vector<16x32xf32> to vector<2x8x32xf32>
    %68 = arith.truncf %67 : vector<2x8x32xf32> to vector<2x8x32xbf16>
    %69 = vector.shape_cast %64 : vector<16x32xf32> to vector<2x8x32xf32>
    %70 = arith.truncf %69 : vector<2x8x32xf32> to vector<2x8x32xbf16>
    "tpu.trace_start"() <{level = 10 : i32, message = "bqd,bkd->bqk"}> : () -> ()
    %cst_24 = arith.constant dense<0.000000e+00> : vector<2x8x8xf32>
    %71 = tpu.matmul %66, %68, %cst_24 {dimension_numbers = #tpu.dot_dimension_numbers<[2], [2], [1], [1], [0, 0, 0, 1, 1, 1], [0], [0]>} : vector<2x8x32xbf16>, vector<2x8x32xbf16>, vector<2x8x8xf32> -> vector<2x8x8xf32>
    "tpu.trace_stop"() : () -> ()
    %cst_25 = arith.constant dense<0xFF800000> : vector<2x8xf32>
    %72 = vector.multi_reduction <maximumf>, %71, %cst_25 [2] : vector<2x8x8xf32> to vector<2x8xf32>
    %73 = vector.shape_cast %72 : vector<2x8xf32> to vector<2x8x1xf32>
    %74 = vector.broadcast %73 : vector<2x8x1xf32> to vector<2x8x8xf32>
    %75 = arith.subf %71, %74 : vector<2x8x8xf32>
    %76 = math.exp %75 : vector<2x8x8xf32>
    %cst_26 = arith.constant dense<0.000000e+00> : vector<2x8xf32>
    %77 = vector.multi_reduction <add>, %76, %cst_26 [2] : vector<2x8x8xf32> to vector<2x8xf32>
    %78 = vector.shape_cast %77 : vector<2x8xf32> to vector<2x8x1xf32>
    %79 = tpu.reciprocal %78 {approx = true} : vector<2x8x1xf32> -> vector<2x8x1xf32>
    %80 = vector.broadcast %79 : vector<2x8x1xf32> to vector<2x8x8xf32>
    %81 = arith.mulf %76, %80 : vector<2x8x8xf32>
    %82 = arith.truncf %81 : vector<2x8x8xf32> to vector<2x8x8xbf16>
    "tpu.trace_start"() <{level = 10 : i32, message = "bqk,bkd->bqd"}> : () -> ()
    %cst_27 = arith.constant dense<0.000000e+00> : vector<2x8x32xf32>
    %83 = tpu.matmul %82, %70, %cst_27 {dimension_numbers = #tpu.dot_dimension_numbers<[2], [1], [1], [2], [0, 0, 0, 1, 1, 2], [0], [0]>} : vector<2x8x8xbf16>, vector<2x8x32xbf16>, vector<2x8x32xf32> -> vector<2x8x32xf32>
    "tpu.trace_stop"() : () -> ()
    %84 = vector.shape_cast %83 : vector<2x8x32xf32> to vector<16x32xf32>
    %85 = tpu.concatenate %61, %84 in 1 : vector<16x32xf32>, vector<16x32xf32> -> vector<16x64xf32>
    %86 = arith.truncf %85 : vector<16x64xf32> to vector<16x64xbf16>
    %c0_28 = arith.constant 0 : index
    %c0_29 = arith.constant 0 : index
    %c0_30 = arith.constant 0 : index
    %87 = vector.load %arg9[%c0_28, %c0_29, %c0_30] : memref<1x64x64xbf16, #tpu.memory_space<vmem>>, vector<1x64x64xbf16>
    %88 = vector.shape_cast %87 : vector<1x64x64xbf16> to vector<64x64xbf16>
    %cst_31 = arith.constant dense<0.000000e+00> : vector<16x64xf32>
    %89 = tpu.matmul %86, %88, %cst_31 {dimension_numbers = #tpu.dot_dimension_numbers<[1], [0], [0], [1], [0, 0, 1, 1], [], []>} : vector<16x64xbf16>, vector<64x64xbf16>, vector<16x64xf32> -> vector<16x64xf32>
    %c0_32 = arith.constant 0 : index
    %c0_33 = arith.constant 0 : index
    %c0_34 = arith.constant 0 : index
    %90 = vector.load %arg10[%c0_32, %c0_33, %c0_34] : memref<1x1x64xf32, #tpu.memory_space<vmem>>, vector<1x1x64xf32>
    %91 = vector.shape_cast %90 : vector<1x1x64xf32> to vector<1x64xf32>
    %92 = vector.broadcast %91 : vector<1x64xf32> to vector<16x64xf32>
    %93 = arith.addf %89, %92 : vector<16x64xf32>
    %94 = arith.addf %3, %93 : vector<16x64xf32>
    %c0_35 = arith.constant 0 : index
    %c0_36 = arith.constant 0 : index
    %c0_37 = arith.constant 0 : index
    %95 = vector.load %arg11[%c0_35, %c0_36, %c0_37] : memref<1x1x64xf32, #tpu.memory_space<vmem>>, vector<1x1x64xf32>
    %96 = vector.shape_cast %95 : vector<1x1x64xf32> to vector<1x64xf32>
    %c0_38 = arith.constant 0 : index
    %c0_39 = arith.constant 0 : index
    %c0_40 = arith.constant 0 : index
    %97 = vector.load %arg12[%c0_38, %c0_39, %c0_40] : memref<1x1x64xf32, #tpu.memory_space<vmem>>, vector<1x1x64xf32>
    %98 = vector.shape_cast %97 : vector<1x1x64xf32> to vector<1x64xf32>
    %cst_41 = arith.constant dense<0.000000e+00> : vector<16xf32>
    %99 = vector.multi_reduction <add>, %94, %cst_41 [1] : vector<16x64xf32> to vector<16xf32>
    %100 = vector.shape_cast %99 : vector<16xf32> to vector<16x1xf32>
    %cst_42 = arith.constant 6.400000e+01 : f32
    %101 = vector.broadcast %cst_42 : f32 to vector<16x1xf32>
    %102 = arith.divf %100, %101 : vector<16x1xf32>
    %103 = vector.broadcast %102 : vector<16x1xf32> to vector<16x64xf32>
    %104 = arith.subf %94, %103 : vector<16x64xf32>
    %105 = arith.mulf %104, %104 : vector<16x64xf32>
    %cst_43 = arith.constant dense<0.000000e+00> : vector<16xf32>
    %106 = vector.multi_reduction <add>, %105, %cst_43 [1] : vector<16x64xf32> to vector<16xf32>
    %107 = vector.shape_cast %106 : vector<16xf32> to vector<16x1xf32>
    %cst_44 = arith.constant 6.400000e+01 : f32
    %108 = vector.broadcast %cst_44 : f32 to vector<16x1xf32>
    %109 = arith.divf %107, %108 : vector<16x1xf32>
    %cst_45 = arith.constant 9.99999974E-6 : f32
    %110 = vector.broadcast %cst_45 : f32 to vector<16x1xf32>
    %111 = arith.addf %109, %110 : vector<16x1xf32>
    %112 = math.rsqrt %111 : vector<16x1xf32>
    %113 = vector.broadcast %112 : vector<16x1xf32> to vector<16x64xf32>
    %114 = arith.mulf %104, %113 : vector<16x64xf32>
    %115 = vector.broadcast %96 : vector<1x64xf32> to vector<16x64xf32>
    %116 = arith.mulf %114, %115 : vector<16x64xf32>
    %117 = vector.broadcast %98 : vector<1x64xf32> to vector<16x64xf32>
    %118 = arith.addf %116, %117 : vector<16x64xf32>
    %119 = arith.truncf %118 : vector<16x64xf32> to vector<16x64xbf16>
    %c0_46 = arith.constant 0 : index
    %c0_47 = arith.constant 0 : index
    %c0_48 = arith.constant 0 : index
    %120 = vector.load %arg13[%c0_46, %c0_47, %c0_48] : memref<1x64x256xbf16, #tpu.memory_space<vmem>>, vector<1x64x256xbf16>
    %121 = vector.shape_cast %120 : vector<1x64x256xbf16> to vector<64x256xbf16>
    %cst_49 = arith.constant dense<0.000000e+00> : vector<16x256xf32>
    %122 = tpu.matmul %119, %121, %cst_49 {dimension_numbers = #tpu.dot_dimension_numbers<[1], [0], [0], [1], [0, 0, 1, 1], [], []>} : vector<16x64xbf16>, vector<64x256xbf16>, vector<16x256xf32> -> vector<16x256xf32>
    %c0_50 = arith.constant 0 : index
    %c0_51 = arith.constant 0 : index
    %c0_52 = arith.constant 0 : index
    %123 = vector.load %arg14[%c0_50, %c0_51, %c0_52] : memref<1x1x256xf32, #tpu.memory_space<vmem>>, vector<1x1x256xf32>
    %124 = vector.shape_cast %123 : vector<1x1x256xf32> to vector<1x256xf32>
    %125 = vector.broadcast %124 : vector<1x256xf32> to vector<16x256xf32>
    %126 = arith.addf %122, %125 : vector<16x256xf32>
    %cst_53 = arith.constant 5.000000e-01 : f32
    %127 = vector.broadcast %cst_53 : f32 to vector<16x256xf32>
    %128 = arith.mulf %127, %126 : vector<16x256xf32>
    %cst_54 = arith.constant 4.471500e-02 : f32
    %129 = vector.broadcast %cst_54 : f32 to vector<16x256xf32>
    %130 = arith.mulf %129, %126 : vector<16x256xf32>
    %131 = arith.mulf %130, %126 : vector<16x256xf32>
    %132 = arith.mulf %131, %126 : vector<16x256xf32>
    %133 = arith.addf %126, %132 : vector<16x256xf32>
    %cst_55 = arith.constant 0.797884583 : f32
    %134 = vector.broadcast %cst_55 : f32 to vector<16x256xf32>
    %135 = arith.mulf %134, %133 : vector<16x256xf32>
    %136 = math.tanh %135 : vector<16x256xf32>
    %cst_56 = arith.constant 1.000000e+00 : f32
    %137 = vector.broadcast %cst_56 : f32 to vector<16x256xf32>
    %138 = arith.addf %137, %136 : vector<16x256xf32>
    %139 = arith.mulf %128, %138 : vector<16x256xf32>
    %140 = arith.truncf %139 : vector<16x256xf32> to vector<16x256xbf16>
    %c0_57 = arith.constant 0 : index
    %c0_58 = arith.constant 0 : index
    %c0_59 = arith.constant 0 : index
    %141 = vector.load %arg15[%c0_57, %c0_58, %c0_59] : memref<1x256x64xbf16, #tpu.memory_space<vmem>>, vector<1x256x64xbf16>
    %142 = vector.shape_cast %141 : vector<1x256x64xbf16> to vector<256x64xbf16>
    %cst_60 = arith.constant dense<0.000000e+00> : vector<16x64xf32>
    %143 = tpu.matmul %140, %142, %cst_60 {dimension_numbers = #tpu.dot_dimension_numbers<[1], [0], [0], [1], [0, 0, 1, 1], [], []>} : vector<16x256xbf16>, vector<256x64xbf16>, vector<16x64xf32> -> vector<16x64xf32>
    %c0_61 = arith.constant 0 : index
    %c0_62 = arith.constant 0 : index
    %c0_63 = arith.constant 0 : index
    %144 = vector.load %arg16[%c0_61, %c0_62, %c0_63] : memref<1x1x64xf32, #tpu.memory_space<vmem>>, vector<1x1x64xf32>
    %145 = vector.shape_cast %144 : vector<1x1x64xf32> to vector<1x64xf32>
    %146 = vector.broadcast %145 : vector<1x64xf32> to vector<16x64xf32>
    %147 = arith.addf %143, %146 : vector<16x64xf32>
    %148 = arith.addf %94, %147 : vector<16x64xf32>
    %c0_64 = arith.constant 0 : index
    %c0_65 = arith.constant 0 : index
    %149 = vector.load %arg22[%c0_64, %c0_65] : memref<16x64xf32, #tpu.memory_space<vmem>>, vector<16x64xf32>
    tpu.vector_store %arg22[%c0_64, %c0_65], %148 {strides = array<i32>} : memref<16x64xf32, #tpu.memory_space<vmem>>, vector<16x64xf32>,
    %c1_i32 = arith.constant 1 : i32
    %150 = arith.cmpi eq, %arg0, %c1_i32 : i32
    %151 = arith.extui %150 : i1 to i32
    %c0_i32_66 = arith.constant 0 : i32
    %152 = arith.cmpi ne, %151, %c0_i32_66 : i32
    scf.if %152 {
      %c0_67 = arith.constant 0 : index
      %c0_68 = arith.constant 0 : index
      %153 = vector.load %arg17[%c0_67, %c0_68] : memref<1x64xf32, #tpu.memory_space<vmem>>, vector<1x64xf32>
      %c0_69 = arith.constant 0 : index
      %c0_70 = arith.constant 0 : index
      %154 = vector.load %arg18[%c0_69, %c0_70] : memref<1x64xf32, #tpu.memory_space<vmem>>, vector<1x64xf32>
      %cst_71 = arith.constant dense<0.000000e+00> : vector<16xf32>
      %155 = vector.multi_reduction <add>, %148, %cst_71 [1] : vector<16x64xf32> to vector<16xf32>
      %156 = vector.shape_cast %155 : vector<16xf32> to vector<16x1xf32>
      %cst_72 = arith.constant 6.400000e+01 : f32
      %157 = vector.broadcast %cst_72 : f32 to vector<16x1xf32>
      %158 = arith.divf %156, %157 : vector<16x1xf32>
      %159 = vector.broadcast %158 : vector<16x1xf32> to vector<16x64xf32>
      %160 = arith.subf %148, %159 : vector<16x64xf32>
      %161 = arith.mulf %160, %160 : vector<16x64xf32>
      %cst_73 = arith.constant dense<0.000000e+00> : vector<16xf32>
      %162 = vector.multi_reduction <add>, %161, %cst_73 [1] : vector<16x64xf32> to vector<16xf32>
      %163 = vector.shape_cast %162 : vector<16xf32> to vector<16x1xf32>
      %cst_74 = arith.constant 6.400000e+01 : f32
      %164 = vector.broadcast %cst_74 : f32 to vector<16x1xf32>
      %165 = arith.divf %163, %164 : vector<16x1xf32>
      %cst_75 = arith.constant 9.99999974E-6 : f32
      %166 = vector.broadcast %cst_75 : f32 to vector<16x1xf32>
      %167 = arith.addf %165, %166 : vector<16x1xf32>
      %168 = math.rsqrt %167 : vector<16x1xf32>
      %169 = vector.broadcast %168 : vector<16x1xf32> to vector<16x64xf32>
      %170 = arith.mulf %160, %169 : vector<16x64xf32>
      %171 = vector.broadcast %153 : vector<1x64xf32> to vector<16x64xf32>
      %172 = arith.mulf %170, %171 : vector<16x64xf32>
      %173 = vector.broadcast %154 : vector<1x64xf32> to vector<16x64xf32>
      %174 = arith.addf %172, %173 : vector<16x64xf32>
      %175 = vector.shape_cast %174 : vector<16x64xf32> to vector<2x8x64xf32>
      %cst_76 = arith.constant dense<0.000000e+00> : vector<2x64xf32>
      %176 = vector.multi_reduction <add>, %175, %cst_76 [1] : vector<2x8x64xf32> to vector<2x64xf32>
      %cst_77 = arith.constant 1.250000e-01 : f32
      %177 = vector.broadcast %cst_77 : f32 to vector<2x64xf32>
      %178 = arith.mulf %176, %177 : vector<2x64xf32>
      %c0_78 = arith.constant 0 : index
      %c0_79 = arith.constant 0 : index
      %179 = vector.load %arg19[%c0_78, %c0_79] : memref<1x64xf32, #tpu.memory_space<vmem>>, vector<1x64xf32>
      %180 = vector.broadcast %179 : vector<1x64xf32> to vector<2x64xf32>
      %181 = arith.mulf %178, %180 : vector<2x64xf32>
      %cst_80 = arith.constant dense<0.000000e+00> : vector<2xf32>
      %182 = vector.multi_reduction <add>, %181, %cst_80 [1] : vector<2x64xf32> to vector<2xf32>
      %183 = vector.shape_cast %182 : vector<2xf32> to vector<2x1xf32>
      %c0_81 = arith.constant 0 : index
      %c0_82 = arith.constant 0 : index
      %184 = vector.load %arg20[%c0_81, %c0_82] : memref<1x1xf32, #tpu.memory_space<vmem>>, vector<1x1xf32>
      %185 = vector.broadcast %184 : vector<1x1xf32> to vector<2x1xf32>
      %186 = arith.addf %183, %185 : vector<2x1xf32>
      %cst_83 = arith.constant 0.000000e+00 : f32
      %187 = vector.broadcast %cst_83 : f32 to vector<2x1xf32>
      %188 = arith.subf %187, %186 : vector<2x1xf32>
      %189 = math.exp %188 : vector<2x1xf32>
      %cst_84 = arith.constant 1.000000e+00 : f32
      %190 = vector.broadcast %cst_84 : f32 to vector<2x1xf32>
      %191 = arith.addf %190, %189 : vector<2x1xf32>
      %cst_85 = arith.constant 1.000000e+00 : f32
      %192 = vector.broadcast %cst_85 : f32 to vector<2x1xf32>
      %193 = arith.divf %192, %191 : vector<2x1xf32>
      %c0_86 = arith.constant 0 : index
      %c0_87 = arith.constant 0 : index
      %194 = vector.load %arg21[%c0_86, %c0_87] : memref<2x1xf32, #tpu.memory_space<vmem>>, vector<2x1xf32>
      tpu.vector_store %arg21[%c0_86, %c0_87], %193 {strides = array<i32>} : memref<2x1xf32, #tpu.memory_space<vmem>>, vector<2x1xf32>,
    } else {
    }
    return
  }
  func.func @transform_0(%arg0: i32) -> (i32, i32) {
    %c0_i32 = arith.constant 0 : i32
    %c0_i32_0 = arith.constant 0 : i32
    %c0_i32_1 = arith.constant 0 : i32
    return %c0_i32, %c0_i32_0 : i32, i32
  }
  func.func @transform_1(%arg0: i32) -> (i32, i32) {
    %c0_i32 = arith.constant 0 : i32
    %c0_i32_0 = arith.constant 0 : i32
    %c0_i32_1 = arith.constant 0 : i32
    return %c0_i32, %c0_i32_0 : i32, i32
  }
  func.func @transform_2(%arg0: i32) -> (i32, i32) {
    %c0_i32 = arith.constant 0 : i32
    %c0_i32_0 = arith.constant 0 : i32
    %c0_i32_1 = arith.constant 0 : i32
    return %c0_i32, %c0_i32_0 : i32, i32
  }
  func.func @transform_3(%arg0: i32) -> (i32, i32) {
    %c0_i32 = arith.constant 0 : i32
    %c0_i32_0 = arith.constant 0 : i32
    %c0_i32_1 = arith.constant 0 : i32
    return %c0_i32, %c0_i32_0 : i32, i32
  }
  func.func @transform_4(%arg0: i32) -> (i32, i32, i32) {
    %c0_i32 = arith.constant 0 : i32
    %c0_i32_0 = arith.constant 0 : i32
    %c0_i32_1 = arith.constant 0 : i32
    return %arg0, %c0_i32, %c0_i32_0 : i32, i32, i32
  }
  func.func @transform_5(%arg0: i32) -> (i32, i32, i32) {
    %c0_i32 = arith.constant 0 : i32
    %c0_i32_0 = arith.constant 0 : i32
    %c0_i32_1 = arith.constant 0 : i32
    return %arg0, %c0_i32, %c0_i32_0 : i32, i32, i32
  }
  func.func @transform_6(%arg0: i32) -> (i32, i32, i32) {
    %c0_i32 = arith.constant 0 : i32
    %c0_i32_0 = arith.constant 0 : i32
    %c0_i32_1 = arith.constant 0 : i32
    return %arg0, %c0_i32, %c0_i32_0 : i32, i32, i32
  }
  func.func @transform_7(%arg0: i32) -> (i32, i32, i32) {
    %c0_i32 = arith.constant 0 : i32
    %c0_i32_0 = arith.constant 0 : i32
    %c0_i32_1 = arith.constant 0 : i32
    return %arg0, %c0_i32, %c0_i32_0 : i32, i32, i32
  }
  func.func @transform_8(%arg0: i32) -> (i32, i32, i32) {
    %c0_i32 = arith.constant 0 : i32
    %c0_i32_0 = arith.constant 0 : i32
    %c0_i32_1 = arith.constant 0 : i32
    return %arg0, %c0_i32, %c0_i32_0 : i32, i32, i32
  }
  func.func @transform_9(%arg0: i32) -> (i32, i32, i32) {
    %c0_i32 = arith.constant 0 : i32
    %c0_i32_0 = arith.constant 0 : i32
    %c0_i32_1 = arith.constant 0 : i32
    return %arg0, %c0_i32, %c0_i32_0 : i32, i32, i32
  }
  func.func @transform_10(%arg0: i32) -> (i32, i32, i32) {
    %c0_i32 = arith.constant 0 : i32
    %c0_i32_0 = arith.constant 0 : i32
    %c0_i32_1 = arith.constant 0 : i32
    return %arg0, %c0_i32, %c0_i32_0 : i32, i32, i32
  }
  func.func @transform_11(%arg0: i32) -> (i32, i32, i32) {
    %c0_i32 = arith.constant 0 : i32
    %c0_i32_0 = arith.constant 0 : i32
    %c0_i32_1 = arith.constant 0 : i32
    return %arg0, %c0_i32, %c0_i32_0 : i32, i32, i32
  }
  func.func @transform_12(%arg0: i32) -> (i32, i32, i32) {
    %c0_i32 = arith.constant 0 : i32
    %c0_i32_0 = arith.constant 0 : i32
    %c0_i32_1 = arith.constant 0 : i32
    return %arg0, %c0_i32, %c0_i32_0 : i32, i32, i32
  }
  func.func @transform_13(%arg0: i32) -> (i32, i32, i32) {
    %c0_i32 = arith.constant 0 : i32
    %c0_i32_0 = arith.constant 0 : i32
    %c0_i32_1 = arith.constant 0 : i32
    return %arg0, %c0_i32, %c0_i32_0 : i32, i32, i32
  }
  func.func @transform_14(%arg0: i32) -> (i32, i32, i32) {
    %c0_i32 = arith.constant 0 : i32
    %c0_i32_0 = arith.constant 0 : i32
    %c0_i32_1 = arith.constant 0 : i32
    return %arg0, %c0_i32, %c0_i32_0 : i32, i32, i32
  }
  func.func @transform_15(%arg0: i32) -> (i32, i32, i32) {
    %c0_i32 = arith.constant 0 : i32
    %c0_i32_0 = arith.constant 0 : i32
    %c0_i32_1 = arith.constant 0 : i32
    return %arg0, %c0_i32, %c0_i32_0 : i32, i32, i32
  }
  func.func @transform_16(%arg0: i32) -> (i32, i32) {
    %c0_i32 = arith.constant 0 : i32
    %c0_i32_0 = arith.constant 0 : i32
    %c0_i32_1 = arith.constant 0 : i32
    return %c0_i32, %c0_i32_0 : i32, i32
  }
  func.func @transform_17(%arg0: i32) -> (i32, i32) {
    %c0_i32 = arith.constant 0 : i32
    %c0_i32_0 = arith.constant 0 : i32
    %c0_i32_1 = arith.constant 0 : i32
    return %c0_i32, %c0_i32_0 : i32, i32
  }
  func.func @transform_18(%arg0: i32) -> (i32, i32) {
    %c0_i32 = arith.constant 0 : i32
    %c0_i32_0 = arith.constant 0 : i32
    %c0_i32_1 = arith.constant 0 : i32
    return %c0_i32, %c0_i32_0 : i32, i32
  }
  func.func @transform_19(%arg0: i32) -> (i32, i32) {
    %c0_i32 = arith.constant 0 : i32
    %c0_i32_0 = arith.constant 0 : i32
    %c0_i32_1 = arith.constant 0 : i32
    return %c0_i32, %c0_i32_0 : i32, i32
  }
  func.func @transform_20(%arg0: i32) -> (i32, i32) {
    %c0_i32 = arith.constant 0 : i32
    %c0_i32_0 = arith.constant 0 : i32
    %c0_i32_1 = arith.constant 0 : i32
    return %c0_i32, %c0_i32_0 : i32, i32
  }
}

</mosaic_0001>

<bundles_post_ra>
// kernel: forward.2
= control target key start
LH: loop header
LB: loop body
LE: loop exit
PB: predicated region body
PF: predicated region fallthrough
CT: control target
= control target key end

     0   :  { %vm49_vm0 = vcmask 392192   ;;  %vm111_vm1 = vcmask 523264   ;;  %s209_s1 = inlined_call_operand.vmem [shape: bf16[48,64], index: 1, kind: input, shape index: {}]   ;;  %s210_s2 = inlined_call_operand.vmem [shape: f32[1,64], index: 2, kind: input, shape index: {}]   ;;  %s211_s0 = inlined_call_operand.vmem [shape: f32[32,48], index: 0, kind: input, shape index: {}]   ;;  %s212_s3 = inlined_call_operand.vmem [shape: f32[32,64], index: 3, kind: output, shape index: {}]  }
   0x1   :  { %v136_v0 = vld [vmem:[%s209_s1 + $0x10] sm:$0xff]  ;;  %v135_v1 = vld [vmem:[%s209_s1 + $0x8] sm:$0xff]  ;;  %v134_v2 = vld [vmem:[%s209_s1] sm:$0xff] }
   0x2   :  { %61 = vmatpush.bf16.msra.mxu0 %v136_v0  ;;  %137 = vmatpush.bf16.msra.mxu1 %v136_v0  ;;  %v15_v3 = vld [vmem:[%s211_s0] sm:$0xff]  ;;  %v16_v4 = vld [vmem:[%s211_s0 + $0x8] sm:$0xff]  ;;  %v17_v5 = vld [vmem:[%s211_s0 + $0x10] sm:$0xff] }
   0x3   :  { %v18_v6 = vld [vmem:[%s211_s0 + $0x18] sm:$0xff]  ;;  %v19_v7 = vpack.c.bf16 %v16_v4, %v15_v3  ;;  %v140_v9 = vld [vmem:[%s210_s2] ss:$0 sm:$0xff] }
   0x4   :  { %v20_v8 = vpack.c.bf16 %v18_v6, %v17_v5 }
   0x6   :  { %62 = vmatpush.bf16.msra.mxu0 %v135_v1  ;;  %138 = vmatpush.bf16.msra.mxu1 %v135_v1 }
   0xa   :  { %63 = vmatpush.bf16.msra.mxu0 %v134_v2  ;;  %139 = vmatpush.bf16.msra.mxu1 %v134_v2 }
   0xd   :  { %132 = vmatmul.msk.bf16.vlgmr.msra.gmra.mxu0 %vm49_vm0, %v19_v7  ;;  %133 = vmatmul.msk.bf16.vlgmr.msra.gmra.mxu1 %vm49_vm0, %v20_v8 }
  0x8a   :  { %v65_v10 = vpop.f32.mrf.mxu0  ;;  %v70_v11 = vpop.f32.mrf.mxu1 }
  0x8b   :  { %v66_v12 = vadd.f32 %v140_v9, %v65_v10  ;;  %v71_v13 = vadd.f32 %v140_v9, %v70_v11 }
  0x8d   :  { %v79_v14 = vmul.f32 0.044715, %v66_v12  ;;  %v81_v15 = vmul.f32 0.044715, %v71_v13  ;;  %v75_v38 = vmul.f32 0.5, %v66_v12  ;;  %v77_v42 = vmul.f32 0.5, %v71_v13 }
  0x8f   :  { %v83_v16 = vmul.f32 %v79_v14, %v66_v12  ;;  %v85_v17 = vmul.f32 %v81_v15, %v71_v13 }
  0x91   :  { %v87_v18 = vmul.f32 %v83_v16, %v66_v12  ;;  %v89_v19 = vmul.f32 %v85_v17, %v71_v13 }
  0x92   :  { %v67_v20 = vpop.f32.mrf.mxu0  ;;  %v72_v21 = vpop.f32.mrf.mxu1 }
  0x93   :  { %v91_v22 = vadd.f32 %v87_v18, %v66_v12  ;;  %v93_v23 = vadd.f32 %v89_v19, %v71_v13  ;;  %v68_v24 = vadd.f32 %v140_v9, %v67_v20  ;;  %v73_v25 = vadd.f32 %v140_v9, %v72_v21 }
  0x95   :  { %v95_v26 = vmul.f32 0.7978846, %v91_v22  ;;  %v97_v27 = vmul.f32 0.7978846, %v93_v23  ;;  %v80_v28 = vmul.f32 0.044715, %v68_v24 }
  0x96   :  { %v82_v29 = vmul.f32 0.044715, %v73_v25  ;;  %v76_v48 = vmul.f32 0.5, %v68_v24  ;;  %v78_v50 = vmul.f32 0.5, %v73_v25 }
  0x97   :  { %141 = vtanh.f32 %v95_v26  ;;  %v84_v30 = vmul.f32 %v80_v28, %v68_v24 }
  0x98   :  { %143 = vtanh.f32 %v97_v27  ;;  %v86_v31 = vmul.f32 %v82_v29, %v73_v25 }
  0x99   :  { %v88_v32 = vmul.f32 %v84_v30, %v68_v24 }
  0x9a   :  { %v90_v33 = vmul.f32 %v86_v31, %v73_v25 }
  0x9b   :  { %v92_v34 = vadd.f32 %v88_v32, %v68_v24 }
  0x9c   :  { %v94_v35 = vadd.f32 %v90_v33, %v73_v25 }
  0x9d   :  { %v142_v36 = vpop.eup %141  ;;  %v96_v40 = vmul.f32 0.7978846, %v92_v34 }
  0x9e   :  { %v144_v37 = vpop.eup %143  ;;  %v103_v39 = vadd.f32 1.0, %v142_v36  ;;  %v98_v41 = vmul.f32 0.7978846, %v94_v35 }
  0x9f   :  { %v105_v43 = vadd.f32 1.0, %v144_v37  ;;  %145 = vtanh.f32 %v96_v40 }
  0xa0   :  { %v107_v44 = vmul.f32 %v103_v39, %v75_v38  ;;  %147 = vtanh.f32 %v98_v41 }
  0xa1   :  { %v109_v45 = vmul.f32 %v105_v43, %v77_v42 }
  0xa2   :  { %112 = vst.msk [vmem:[%s212_s3] sm:$0xff] %vm111_vm1, %v107_v44 }
  0xa3   :  { %114 = vst.msk [vmem:[%s212_s3 + $0x10] sm:$0xff] %vm111_vm1, %v109_v45 }
  0xa5   :  { %v146_v46 = vpop.eup %145 }
  0xa6   :  { %v148_v47 = vpop.eup %147  ;;  %v104_v49 = vadd.f32 1.0, %v146_v46 }
  0xa7   :  { %v106_v51 = vadd.f32 1.0, %v148_v47 }
  0xa8   :  { %v108_v52 = vmul.f32 %v104_v49, %v76_v48 }
  0xa9   :  { %v110_v53 = vmul.f32 %v106_v51, %v78_v50 }
  0xaa   :  { %113 = vst.msk [vmem:[%s212_s3 + $0x8] sm:$0xff] %vm111_vm1, %v108_v52 }
  0xab   :  { %115 = vst.msk [vmem:[%s212_s3 + $0x18] sm:$0xff] %vm111_vm1, %v110_v53 }

// kernel: forward.3
= control target key start
LH: loop header
LB: loop body
LE: loop exit
PB: predicated region body
PF: predicated region fallthrough
CT: control target
= control target key end

     0   :  { %s2503_s23 = smov 0   ;;  %s2858_s0 = inlined_call_operand.vmem [shape: f32[16,192], index: 0, kind: input, shape index: {}]   ;;  %s2859_s1 = inlined_call_operand.vmem [shape: bf16[192,64], index: 1, kind: input, shape index: {}]   ;;  %s2860_s2 = inlined_call_operand.vmem [shape: f32[1,64], index: 2, kind: input, shape index: {}]   ;;  %s2861_s3 = inlined_call_operand.vmem [shape: f32[16,64], index: 3, kind: input, shape index: {}]   ;;  %s2862_s4 = inlined_call_operand.vmem [shape: f32[2,1,64], index: 4, kind: input, shape index: {}]   ;;  %s2863_s5 = inlined_call_operand.vmem [shape: f32[2,1,64], index: 5, kind: input, shape index: {}]   ;;  %s2864_s6 = inlined_call_operand.vmem [shape: bf16[2,64,192], index: 6, kind: input, shape index: {}]   ;;  %s2865_s7 = inlined_call_operand.vmem [shape: f32[2,1,192], index: 7, kind: input, shape index: {}]   ;;  %s2866_s8 = inlined_call_operand.vmem [shape: bf16[2,64,64], index: 8, kind: input, shape index: {}]   ;;  %s2867_s9 = inlined_call_operand.vmem [shape: f32[2,1,64], index: 9, kind: input, shape index: {}]   ;;  %s2868_s10 = inlined_call_operand.vmem [shape: f32[2,1,64], index: 10, kind: input, shape index: {}]   ;;  %s2869_s11 = inlined_call_operand.vmem [shape: f32[2,1,64], index: 11, kind: input, shape index: {}]   ;;  %s2870_s12 = inlined_call_operand.vmem [shape: bf16[2,64,256], index: 12, kind: input, shape index: {}]   ;;  %s2871_s13 = inlined_call_operand.vmem [shape: f32[2,1,256], index: 13, kind: input, shape index: {}]   ;;  %s2872_s14 = inlined_call_operand.vmem [shape: bf16[2,256,64], index: 14, kind: input, shape index: {}]   ;;  %s2873_s15 = inlined_call_operand.vmem [shape: f32[2,1,64], index: 15, kind: input, shape index: {}]   ;;  %s2874_s16 = inlined_call_operand.vmem [shape: f32[1,64], index: 16, kind: input, shape index: {}]   ;;  %s2875_s17 = inlined_call_operand.vmem [shape: f32[1,64], index: 17, kind: input, shape index: {}]   ;;  %s2876_s18 = inlined_call_operand.vmem [shape: f32[1,64], index: 18, kind: input, shape index: {}]   ;;  %s2877_s19 = inlined_call_operand.<no memory space> [shape: f32[1,1], index: 19, kind: input, shape index: {}]   ;;  %s2878_s20 = inlined_call_operand.vmem [shape: f32[2,1], index: 20, kind: output, shape index: {}]  }
   0x1   :  { %2883 = sst [smem:[#allocation5_spill]] %s2858_s0  ;;  %v25_v0 = vstv %s2877_s19 }
   0x2   :  { %2884 = sst [smem:[#allocation6_spill]] %s2859_s1  ;;  %26 = vst [vmem:[#allocation3] sm:$0x1] %v25_v0 }
   0x3   :  { %2885 = sst [smem:[#allocation7_spill]] %s2860_s2 }
   0x4   :  { %2886 = sst [smem:[#allocation8_spill]] %s2861_s3 }
   0x5   :  { %2887 = sst [smem:[#allocation9_spill]] %s2862_s4 }
   0x6   :  { %2888 = sst [smem:[#allocation10_spill]] %s2863_s5 }
   0x7   :  { %2889 = sst [smem:[#allocation11_spill]] %s2864_s6 }
   0x8   :  { %2890 = sst [smem:[#allocation12_spill]] %s2865_s7 }
   0x9   :  { %2891 = sst [smem:[#allocation13_spill]] %s2874_s16 }
   0xa   :  { %2892 = sst [smem:[#allocation14_spill]] %s2875_s17 }
   0xb   :  { %2893 = sst [smem:[#allocation15_spill]] %s2876_s18 }
   0xc LB: > { %2894 = sst [smem:[#allocation4_spill]] %s2388_s23  ;;  %s2509_s24 = sadd.s32 4294967295, %s2388_s23   ;;  %s2388_s23 = sphi %s2503_s23, %s32_s23  }
   0xd   : > { %p2034_p0 = scmp.ge.s32.totalorder %s2388_s23, 1  ;;  %p655_p1 = scmp.lt.s32.totalorder %s2388_s23, 3 }
   0xf   : > { %p656_p2 = pnand %p2034_p0, %p655_p1 }
  0x10   : > { %p749_p3 = scmp.lt.s32.totalorder (!%p656_p2), %s2509_s24, 1  ;;  %s2897_s6 = sld [smem:[#allocation11_spill]] (!%p656_p2) }
  0x11   : > { %659 = sbr.rel (%p656_p2) target bundleno = 2953 (0xb89), region = 100  ;;  %s2898_s7 = sld [smem:[#allocation12_spill]] (!%p656_p2) }
  0x12   : > { %p2045_p4 = scmp.ne.s32.totalorder (!%p656_p2), %s2509_s24, 0 }
  0x16   : > { %s2515_s19 = scalar_select %p749_p3, %s2509_s24, 1 }
  0x17   : > { %s2899_s21 = sld [smem:[#allocation6_spill]] (!%p2045_p4) }
  0x18   : > { %s2255_s29 = sshll.u32 %s2515_s19, 6  ;;  %s2037_s30 = sshll.u32 %s2515_s19, 1 }
  0x19   : > { %s2530_s1 = scalar_lea.vmem %s2897_s6, %s2255_s29  ;;  %s2535_s25 = scalar_lea.vmem %s2898_s7, %s2037_s30 }
  0x1a   : > { %s2256_s23 = sshll.u32 %s2515_s19, 5  ;;  %s777_s22 = scalar_lea.vmem %s2869_s11, %s2515_s19 }
  0x1b   : > { %s2545_s28 = scalar_lea.vmem %s2866_s8, %s2256_s23  ;;  %s2558_s5 = scalar_lea.vmem %s2870_s12, %s2255_s29 }
  0x1c   : > { %s2563_s3 = scalar_lea.vmem %s2871_s13, %s2037_s30  ;;  %s2258_s23 = sshll.u32 %s2515_s19, 7 }
  0x1d   : > { %s2569_s16 = scalar_lea.vmem %s2872_s14, %s2258_s23  ;;  %s794_s6 = scalar_lea.vmem %s2873_s15, %s2515_s19 }
  0x1e   : > { %799 = sbr.rel (%p2045_p4) target bundleno = 229 (0xe5), region = 104  ;;  %s2900_s0 = sld [smem:[#allocation5_spill]] (!%p2045_p4) }
  0x1f   : > { %s2901_s30 = sld [smem:[#allocation7_spill]] (!%p2045_p4) }
  0x20   : > { %s2902_s27 = sld [smem:[#allocation8_spill]] (!%p2045_p4) }
  0x23   : > { %v2266_v1 = vld [vmem:[%s2899_s21 + $0x38] sm:$0xff]  ;;  %v2265_v3 = vld [vmem:[%s2899_s21 + $0x30] sm:$0xff]  ;;  %v2264_v5 = vld [vmem:[%s2899_s21 + $0x28] sm:$0xff]  ;;  %vm906_vm0 = vcmask 523264   ;;  %vm962_vm1 = vcmask 1024   ;;  %v2390_v24 = vmov 0.0  }
  0x24   : > { %v2270_v2 = vld [vmem:[%s2899_s21 + $0x58] sm:$0xff]  ;;  %910 = vmatpush.bf16.msra.mxu0 %v2266_v1  ;;  %v2269_v4 = vld [vmem:[%s2899_s21 + $0x50] sm:$0xff]  ;;  %v2268_v6 = vld [vmem:[%s2899_s21 + $0x48] sm:$0xff]  ;;  %963 = vst.msk [vmem:[%s2878_s20] sm:$0x3] %vm962_vm1, %v2390_v24 }
  0x25   : > { %928 = vmatpush.bf16.msra.mxu1 %v2270_v2  ;;  %v2263_v7 = vld [vmem:[%s2899_s21 + $0x20] sm:$0xff]  ;;  %v801_v9 = vld [vmem:[%s2900_s0 + $0x8] sm:$0xff]  ;;  %v803_v10 = vld [vmem:[%s2900_s0 + $0x18] sm:$0xff] }
  0x26   : > { %v2267_v8 = vld [vmem:[%s2899_s21 + $0x40] sm:$0xff]  ;;  %v2262_v11 = vld [vmem:[%s2899_s21 + $0x18] sm:$0xff]  ;;  %v805_v12 = vpack.c.bf16 %v803_v10, %v801_v9  ;;  %v2261_v13 = vld [vmem:[%s2899_s21 + $0x10] sm:$0xff] }
  0x27   : > { %v2260_v14 = vld [vmem:[%s2899_s21 + $0x8] sm:$0xff]  ;;  %v2259_v15 = vld [vmem:[%s2899_s21] sm:$0xff]  ;;  %v802_v17 = vld [vmem:[%s2900_s0 + $0x10] sm:$0xff] }
  0x28   : > { %911 = vmatpush.bf16.msra.mxu0 %v2265_v3  ;;  %v800_v16 = vld [vmem:[%s2900_s0] sm:$0xff]  ;;  %v957_v48 = vld [vmem:[%s2902_s27 + $0x8] sm:$0xff] }
  0x29   : > { %929 = vmatpush.bf16.msra.mxu1 %v2269_v4  ;;  %v804_v18 = vpack.c.bf16 %v802_v17, %v800_v16  ;;  %v2320_v19 = vld [vmem:[%s2901_s30] ss:$0 sm:$0xff] }
  0x2a   : > { %v956_v42 = vld [vmem:[%s2902_s27] sm:$0xff] }
  0x2c   : > { %912 = vmatpush.bf16.msra.mxu0 %v2264_v5 }
  0x2d   : > { %930 = vmatpush.bf16.msra.mxu1 %v2268_v6 }
  0x30   : > { %913 = vmatpush.bf16.msra.mxu0 %v2263_v7 }
  0x31   : > { %931 = vmatpush.bf16.msra.mxu1 %v2267_v8 }
  0x34   : > { %914 = vmatpush.bf16.msra.mxu0 %v2262_v11  ;;  %2094 = vmatmul.msk.bf16.vlgmr.msra.gmra.mxu1 %vm906_vm0, %v805_v12 }
  0x38   : > { %915 = vmatpush.bf16.msra.mxu0 %v2261_v13 }
  0x3c   : > { %916 = vmatpush.bf16.msra.mxu0 %v2260_v14 }
  0x40   : > { %917 = vmatpush.bf16.msra.mxu0 %v2259_v15 }
  0x43   : > { %918 = vmatmul.bf16.vlgmr.msra.gmra.mxu0 %v804_v18 }
  0xb1   : > { %v933_v20 = vpop.f32.mrf.mxu1 }
  0xb9   : > { %v935_v30 = vpop.f32.mrf.mxu1 }
  0xc0   : > { %v919_v21 = vpop.f32.mrf.mxu0 }
  0xc1   : > { %v920_v22 = vadd.f32 %v2320_v19, %v919_v21 }
  0xc3   : > { %v934_v23 = vadd.f32 %v933_v20, %v920_v22 }
  0xc5   : > { %v940_v25 = vmul.f32 0.044715, %v934_v23  ;;  %v938_v40 = vmul.f32 0.5, %v934_v23 }
  0xc7   : > { %v942_v26 = vmul.f32 %v940_v25, %v934_v23 }
  0xc8   : > { %v921_v27 = vpop.f32.mrf.mxu0 }
  0xc9   : > { %v944_v28 = vmul.f32 %v942_v26, %v934_v23  ;;  %v922_v29 = vadd.f32 %v2320_v19, %v921_v27 }
  0xcb   : > { %v946_v31 = vadd.f32 %v944_v28, %v934_v23  ;;  %v936_v32 = vadd.f32 %v935_v30, %v922_v29 }
  0xcd   : > { %v948_v33 = vmul.f32 0.7978846, %v946_v31  ;;  %v941_v34 = vmul.f32 0.044715, %v936_v32  ;;  %v939_v46 = vmul.f32 0.5, %v936_v32 }
  0xcf   : > { %2321 = vtanh.f32 %v948_v33  ;;  %v943_v35 = vmul.f32 %v941_v34, %v936_v32 }
  0xd1   : > { %v945_v36 = vmul.f32 %v943_v35, %v936_v32 }
  0xd3   : > { %v947_v37 = vadd.f32 %v945_v36, %v936_v32 }
  0xd5   : > { %v2322_v38 = vpop.eup %2321  ;;  %v949_v39 = vmul.f32 0.7978846, %v947_v37 }
  0xd6   : > { %v952_v41 = vadd.f32 1.0, %v2322_v38 }
  0xd7   : > { %2323 = vtanh.f32 %v949_v39 }
  0xd8   : > { %v954_v43 = vmul.f32 %v952_v41, %v938_v40 }
  0xda   : > { %v958_v44 = vadd.f32 %v956_v42, %v954_v43 }
  0xdc   : > { %960 = vst.msk [vmem:[#allocation2] sm:$0xff] %vm906_vm0, %v958_v44 }
  0xdd   : > { %v2324_v45 = vpop.eup %2323 }
  0xde   : > { %v953_v47 = vadd.f32 1.0, %v2324_v45 }
  0xe0   : > { %v955_v49 = vmul.f32 %v953_v47, %v939_v46 }
  0xe2   : > { %v959_v50 = vadd.f32 %v957_v48, %v955_v49 }
  0xe4   : > { %961 = vst.msk [vmem:[#allocation2 + $0x8] sm:$0xff] %vm906_vm0, %v959_v50 }
  0xe5 PF: > { %v2639_v51 = vld [vmem:[#allocation2] sm:$0xff]  ;;  %vm968_vm2 = vcmask 523264   ;;  %v2391_v55 = vmov 64.0   ;;  %v2121_v8 = vld [vmem:[%s2530_s1 + $0x30] sm:$0xf]  ;;  %s2903_s2 = sld [smem:[#allocation9_spill]] }
  0xe6   : > { %v969_v52 = vsel %vm968_vm2, %v2639_v51, 0.0  ;;  %2336 = vrcp.f32 %v2391_v55  ;;  %v2278_v9 = vld [vmem:[%s2530_s1 + $0x34] sm:$0xf0]  ;;  %v2113_v11 = vld [vmem:[%s2530_s1 + $0x20] sm:$0xf]  ;;  %s2905_s23 = sld [smem:[#allocation10_spill]] }
  0xe7   : > { %970 = vadd.xlane.f32.xlu0 %v969_v52  ;;  %v2122_v10 = vor.u32 %v2278_v9, %v2121_v8  ;;  %v2276_v12 = vld [vmem:[%s2530_s1 + $0x24] sm:$0xf0]  ;;  %v2105_v14 = vld [vmem:[%s2530_s1 + $0x10] sm:$0xf]  ;;  %v2274_v15 = vld [vmem:[%s2530_s1 + $0x14] sm:$0xf0] }
  0xe8   : > { %v2114_v13 = vor.u32 %v2276_v12, %v2113_v11  ;;  %v2106_v16 = vor.u32 %v2274_v15, %v2105_v14  ;;  %v2097_v17 = vld [vmem:[%s2530_s1] sm:$0xf]  ;;  %v2272_v18 = vld [vmem:[%s2530_s1 + $0x4] sm:$0xf0]  ;;  %v2277_v23 = vld [vmem:[%s2530_s1 + $0x34] sm:$0xf] }
  0xe9   : > { %1092 = vmatpush.bf16.msra.mxu1 %v2122_v10  ;;  %v2098_v20 = vor.u32 %v2272_v18, %v2097_v17  ;;  %v2123_v24 = vld [vmem:[%s2530_s1 + $0x38] sm:$0xf0]  ;;  %v2275_v26 = vld [vmem:[%s2530_s1 + $0x24] sm:$0xf]  ;;  %v2115_v27 = vld [vmem:[%s2530_s1 + $0x28] sm:$0xf0] }
  0xea   : > { %v2126_v25 = vor.u32 %v2277_v23, %v2123_v24  ;;  %v2118_v29 = vor.u32 %v2275_v26, %v2115_v27  ;;  %v2273_v31 = vld [vmem:[%s2530_s1 + $0x14] sm:$0xf]  ;;  %v2107_v32 = vld [vmem:[%s2530_s1 + $0x18] sm:$0xf0]  ;;  %v2271_v37 = vld [vmem:[%s2530_s1 + $0x4] sm:$0xf] }
  0xeb   : > { %v2643_v53 = vld [vmem:[#allocation2 + $0x8] sm:$0xff]  ;;  %v2110_v36 = vor.u32 %v2273_v31, %v2107_v32  ;;  %s2904_s30 = scalar_lea.vmem %s2903_s2, %s2515_s19  ;;  %s2392_s4 = smov 32   ;;  %vm1201_vm10 = vcmask 1043456   ;;  %vm1129_vm11 = vcmask 261120   ;;  %vm1173_vm12 = vcmask 64512  }
  0xec   : > { %v972_v54 = vsel %vm968_vm2, %v2643_v53, 0.0  ;;  %v2337_v56 = vpop.eup %2336  ;;  %v2099_v38 = vld [vmem:[%s2530_s1 + $0x8] sm:$0xf0]  ;;  %v2330_v52 = vld [vmem:[%s2904_s30] ss:$0 sm:$0xff]  ;;  %s2906_s26 = scalar_lea.vmem %s2905_s23, %s2515_s19  ;;  %s2393_s7 = smov 64  }
  0xed   : > { %v976_v57 = vmul.f32 64.0, %v2337_v56  ;;  %vm980_vm3 = vweird.f32 %v2337_v56  ;;  %1093 = vmatpush.bf16.msra.mxu1 %v2114_v13  ;;  %v2102_v41 = vor.u32 %v2271_v37, %v2099_v38  ;;  %s2907_s2 = scalar_lea.vmem %s2867_s9, %s2515_s19  ;;  %s2908_s30 = scalar_lea.vmem %s2868_s10, %s2515_s19 }
  0xee   : > { %p2252_p5 = scmp.ne.s32.totalorder %s2509_s24, 1 }
  0xef   : > { %973 = vadd.xlane.f32.xlu0 %v972_v54  ;;  %v977_v58 = vsub.f32 1.0, %v976_v57 }
  0xf1   : > { %v978_v59 = vmul.f32 %v2337_v56, %v977_v58  ;;  %1094 = vmatpush.bf16.msra.mxu1 %v2106_v16  ;;  %v2331_v58 = vld [vmem:[%s2906_s26] ss:$0 sm:$0xff]  ;;  %s2910_s26 = sld [smem:[#allocation14_spill]] (!%p2252_p5) }
  0xf3   : > { %v979_v60 = vadd.f32 %v2337_v56, %v978_v59 }
  0xf5   : > { %v2647_v61 = vsel %vm980_vm3, %v2337_v56, %v979_v60  ;;  %1095 = vmatpush.bf16.msra.mxu1 %v2098_v20 }
  0xf9   : > { %1106 = vmatpush.bf16.msrb.mxu1 %v2126_v25 }
  0xfd   : > { %1107 = vmatpush.bf16.msrb.mxu1 %v2118_v29 }
 0x101   : > { %1108 = vmatpush.bf16.msrb.mxu1 %v2110_v36 }
 0x105   : > { %1109 = vmatpush.bf16.msrb.mxu1 %v2102_v41 }
 0x15a   : > { %v971_v62 = vpop.xlane.xlu0 %970 }
 0x15b   : > { %v982_v63 = vmul.f32 %v2647_v61, %v971_v62 }
 0x15d   : > { %v2651_v0 = vsub.f32 %v2639_v51, %v982_v63 }
 0x15f   : > { %v986_v1 = vmul.f32 %v2651_v0, %v2651_v0 }
 0x161   : > { %v988_v2 = vsel %vm968_vm2, %v986_v1, 0.0 }
 0x162   : > { %989 = vadd.xlane.f32.xlu1 %v988_v2  ;;  %v974_v3 = vpop.xlane.xlu0 %973 }
 0x163   : > { %v983_v4 = vmul.f32 %v2647_v61, %v974_v3 }
 0x165   : > { %v2658_v5 = vsub.f32 %v2643_v53, %v983_v4 }
 0x167   : > { %v987_v6 = vmul.f32 %v2658_v5, %v2658_v5 }
 0x169   : > { %v991_v7 = vsel %vm968_vm2, %v987_v6, 0.0 }
 0x16a   : > { %992 = vadd.xlane.f32.xlu1 %v991_v7 }
 0x1d5   : > { %v990_v19 = vpop.xlane.xlu1 %989 }
 0x1d6   : > { %v994_v21 = vmul.f32 %v990_v19, %v2647_v61 }
 0x1d8   : > { %v996_v22 = vadd.f32 1e-05, %v994_v21 }
 0x1da   : > { %2338 = vrsqrt.f32 %v996_v22  ;;  %vm1004_vm5 = vweird.f32 %v996_v22 }
 0x1dd   : > { %v993_v28 = vpop.xlane.xlu1 %992 }
 0x1de   : > { %v995_v30 = vmul.f32 %v993_v28, %v2647_v61 }
 0x1e0   : > { %v2339_v33 = vpop.eup %2338  ;;  %v997_v34 = vadd.f32 1e-05, %v995_v30 }
 0x1e1   : > { %v999_v35 = vmul.f32 %v2339_v33, %v996_v22  ;;  %vm1005_vm4 = vweird.f32 %v2339_v33 }
 0x1e2   : > { %2340 = vrsqrt.f32 %v997_v34  ;;  %vm1006_vm6 = vmor %vm1004_vm5, %vm1005_vm4  ;;  %vm1014_vm8 = vweird.f32 %v997_v34 }
 0x1e3   : > { %v1000_v39 = vmul.f32 %v2339_v33, %v999_v35 }
 0x1e5   : > { %v1001_v40 = vmul.f32 0.5, %v1000_v39 }
 0x1e7   : > { %v1002_v42 = vsub.f32 1.5, %v1001_v40 }
 0x1e8   : > { %v2341_v43 = vpop.eup %2340 }
 0x1e9   : > { %v1003_v44 = vmul.f32 %v2339_v33, %v1002_v42  ;;  %v1009_v45 = vmul.f32 %v2341_v43, %v997_v34  ;;  %vm1015_vm7 = vweird.f32 %v2341_v43 }
 0x1ea   : > { %vm1016_vm9 = vmor %vm1014_vm8, %vm1015_vm7 }
 0x1eb   : > { %v1010_v46 = vmul.f32 %v2341_v43, %v1009_v45  ;;  %v1007_v47 = vsel %vm1006_vm6, %v2339_v33, %v1003_v44 }
 0x1ec   : > { %v1018_v50 = vmul.f32 %v1007_v47, %v2651_v0  ;;  %v1039_v0 = vld [vmem:[%s2535_s25] sm:$0x3]  ;;  %s2394_s25 = smov 96  }
 0x1ed   : > { %v1011_v48 = vmul.f32 0.5, %v1010_v46  ;;  %v1041_v1 = vperm.slane %v1039_v0, 0  ;;  %v1042_v11 = vperm.slane %v1039_v0, 1 }
 0x1ee   : > { %v1023_v57 = vmul.f32 %v2330_v52, %v1018_v50 }
 0x1ef   : > { %v1012_v49 = vsub.f32 1.5, %v1011_v48 }
 0x1f0   : > { %v1028_v60 = vadd.f32 %v2331_v58, %v1023_v57 }
 0x1f1   : > { %v1013_v54 = vmul.f32 %v2341_v43, %v1012_v49 }
 0x1f3   : > { %v1017_v55 = vsel %vm1016_vm9, %v2341_v43, %v1013_v54 }
 0x1f4   : > { %v1019_v56 = vmul.f32 %v1017_v55, %v2658_v5 }
 0x1f6   : > { %v1024_v59 = vmul.f32 %v2330_v52, %v1019_v56 }
 0x1f8   : > { %v1029_v62 = vadd.f32 %v2331_v58, %v1024_v59 }
 0x1fa   : > { %v1030_v63 = vpack.c.bf16 %v1029_v62, %v1028_v60 }
 0x1fc   : > { %2127 = vmatmul.msk.bf16.vlgmr.msra.gmra.mxu1 %vm968_vm2, %v1030_v63 }
 0x20c   : > { %2128 = vmatmul.msk.bf16.vlgmr.msrb.gmra.mxu1 %vm968_vm2, %v1030_v63 }
 0x279   : > { %v1097_v2 = vpop.f32.mrf.mxu1 }
 0x27a   : > { %v1098_v3 = vadd.f32 %v1097_v2, %v1041_v1 }
 0x27c   : > { %v1120_v4 = vpack.c.bf16 %v1098_v3, %v1098_v3  ;;  %v1116_v9 = vmul.f32 0.17677669, %v1098_v3 }
 0x27e   : > { %v1125_v5 = vunpack.c.l.b16 %v1120_v4  ;;  %v1118_v13 = vpack.c.bf16 %v1116_v9, %v1116_v9 }
 0x280   : > { %v1126_v6 = vpack.c.b16 %v1125_v5, %v1125_v5  ;;  %v1238_v17 = vunpack.c.l.b16 %v1118_v13 }
 0x281   : > { %v1099_v7 = vpop.f32.mrf.mxu1 }
 0x282   : > { %v1100_v8 = vadd.f32 %v1099_v7, %v1041_v1  ;;  %1242 = vrot.lane.b32.xlu1 %v1126_v6, %s2392_s4  ;;  %1127 = vrot.lane.b32.xlu0 %v1126_v6, %s2393_s7  ;;  %v1239_v18 = vpack.c.b16 %v1238_v17, %v1238_v17 }
 0x284   : > { %v1121_v10 = vpack.c.bf16 %v1100_v8, %v1100_v8  ;;  %v1117_v25 = vmul.f32 0.17677669, %v1100_v8 }
 0x286   : > { %v1150_v12 = vunpack.c.l.b16 %v1121_v10  ;;  %v1119_v26 = vpack.c.bf16 %v1117_v25, %v1117_v25 }
 0x288   : > { %v1151_v14 = vpack.c.b16 %v1150_v12, %v1150_v12  ;;  %v1264_v52 = vunpack.c.l.b16 %v1119_v26 }
 0x289   : > { %v1111_v15 = vpop.f32.mrf.mxu1 }
 0x28a   : > { %v1112_v16 = vadd.f32 %v1111_v15, %v1042_v11  ;;  %1152 = vrot.lane.b32.xlu2 %v1151_v14, %s2393_s7  ;;  %1268 = vrot.lane.b32.xlu0 %v1151_v14, %s2392_s4  ;;  %v1265_v54 = vpack.c.b16 %v1264_v52, %v1264_v52 }
 0x28c   : > { %v2705_v27 = vpack.c.bf16 %v1112_v16, %v1112_v16 }
 0x28e   : > { %v1203_v32 = vsel %vm1201_vm10, %v2705_v27, 0 }
 0x291   : > { %v1113_v19 = vpop.f32.mrf.mxu1 }
 0x292   : > { %v1114_v20 = vadd.f32 %v1113_v19, %v1042_v11  ;;  %1240 = vrot.lane.b32.xlu0 %v1239_v18, %s2394_s25 }
 0x294   : > { %v2699_v21 = vpack.c.bf16 %v1114_v20, %v1114_v20 }
 0x296   : > { %v1222_v22 = vsel %vm1201_vm10, %v2699_v21, 0  ;;  %v1338_v12 = vunpack.c.l.b16 %v2699_v21 }
 0x297   : > { %1231 = vmatpush.bf16.msra.mxu0 %v1222_v22 }
 0x2e4   : > { %v1153_v23 = vpop.permute.xlu2 %1152 }
 0x2e5   : > { %v1158_v24 = vsel %vm1129_vm11, %v1153_v23, 0 }
 0x2e6   : > { %1167 = vmatpush.bf16.xpose.msra.mxu3 %v1158_v24 }
 0x2ed   : > { %2130 = vmatmul.msk.bf16.vlgmr.msra.gmra.mxu3 %vm1129_vm11, %v1119_v26  ;;  %v1314_v26 = vunpack.c.l.b16 %v2705_v27 }
 0x2f4   : > { %v1243_v28 = vpop.permute.xlu1 %1242  ;;  %v1128_v29 = vpop.permute.xlu0 %1127 }
 0x2f5   : > { %v1134_v30 = vsel %vm1129_vm11, %v1128_v29, 0  ;;  %v1248_v31 = vsel %vm1129_vm11, %v1243_v28, 0  ;;  %v1315_v28 = vpack.c.b16 %v1314_v26, %v1314_v26 }
 0x2f6   : > { %1143 = vmatpush.bf16.xpose.msra.mxu2 %v1134_v30  ;;  %1257 = vmatpush.bf16.xpose.msrb.mxu0 %v1248_v31 }
 0x2fc   : > { %v1269_v33 = vpop.permute.xlu0 %1268 }
 0x2fd   : > { %v1274_v34 = vsel %vm1129_vm11, %v1269_v33, 0  ;;  %2129 = vmatmul.msk.bf16.vlgmr.msra.gmra.mxu2 %vm1129_vm11, %v1118_v13  ;;  %v1339_v13 = vpack.c.b16 %v1338_v12, %v1338_v12 }
 0x2fe   : > { %1212 = vmatpush.bf16.msrb.mxu2 %v1203_v32  ;;  %1283 = vmatpush.bf16.xpose.msra.mxu1 %v1274_v34 }
 0x304   : > { %v1241_v1 = vpop.permute.xlu0 %1240 }
 0x370   : > { %v1169_v35 = vpop.f32.mrf.mxu3 }
 0x371   : > { %v1177_v36 = vsel %vm1173_vm12, %v1169_v35, -inf }
 0x372   : > { %1178 = vmax.xlane.f32.xlu2 %v1177_v36 }
 0x378   : > { %v1171_v37 = vpop.f32.mrf.mxu3 }
 0x380   : > { %v1145_v38 = vpop.f32.mrf.mxu2 }
 0x381   : > { %v1174_v39 = vsel %vm1173_vm12, %v1145_v38, -inf }
 0x382   : > { %1175 = vmax.xlane.f32.xlu2 %v1174_v39  ;;  %v2281_v39 = vld [vmem:[%s2545_s28 + $0x10] sm:$0xff] }
 0x388   : > { %v1147_v40 = vpop.f32.mrf.mxu2 }
 0x389   : > { %v2280_v40 = vld [vmem:[%s2545_s28 + $0x8] sm:$0xff] }
 0x3e5   : > { %v1179_v41 = vpop.xlane.xlu2 %1178 }
 0x3e6   : > { %v1181_v42 = vsub.f32 %v1169_v35, %v1179_v41 }
 0x3e8   : > { %v1184_v43 = vmul.f32 1.442695, %v1181_v42 }
 0x3ea   : > { %2342 = vpow2.f32 %v1184_v43 }
 0x3f0   : > { %v2343_v44 = vpop.eup %2342 }
 0x3f1   : > { %v1189_v45 = vsel %vm1173_vm12, %v2343_v44, 0.0 }
 0x3f2   : > { %1190 = vadd.xlane.f32.xlu1 %v1189_v45 }
 0x3f5   : > { %v1176_v46 = vpop.xlane.xlu2 %1175 }
 0x3f6   : > { %v1180_v47 = vsub.f32 %v1145_v38, %v1176_v46  ;;  %v2282_v38 = vld [vmem:[%s2545_s28 + $0x18] sm:$0xff]  ;;  %v2279_v46 = vld [vmem:[%s2545_s28] sm:$0xff] }
 0x3f8   : > { %v1182_v48 = vmul.f32 1.442695, %v1180_v47 }
 0x3fa   : > { %2344 = vpow2.f32 %v1182_v48 }
 0x400   : > { %v2345_v49 = vpop.eup %2344 }
 0x401   : > { %v1186_v50 = vsel %vm1173_vm12, %v2345_v49, 0.0 }
 0x402   : > { %1187 = vadd.xlane.f32.xlu2 %v1186_v50 }
 0x40b   : > { %1266 = vrot.lane.b32.xlu1 %v1265_v54, %s2394_s25 }
 0x465   : > { %v1191_v55 = vpop.xlane.xlu1 %1190 }
 0x466   : > { %2346 = vrcp.f32 %v1191_v55  ;;  %v2332_v55 = vld [vmem:[%s2907_s2] ss:$0 sm:$0xff] }
 0x46c   : > { %v2347_v56 = vpop.eup %2346 }
 0x46d   : > { %v1195_v57 = vmul.f32 %v2347_v56, %v2343_v44 }
 0x46f   : > { %v1197_v58 = vpack.c.bf16 %v1195_v57, %v1195_v57 }
 0x471   : > { %2132 = vmatmul.msk.bf16.vlgmr.msra.gmra.mxu0 %vm1173_vm12, %v1197_v58 }
 0x472   : > { %1415 = vmatpush.bf16.msra.mxu0 %v2282_v38 }
 0x475   : > { %v1188_v59 = vpop.xlane.xlu2 %1187 }
 0x476   : > { %2348 = vrcp.f32 %v1188_v59  ;;  %1416 = vmatpush.bf16.msra.mxu0 %v2281_v39 }
 0x47a   : > { %1417 = vmatpush.bf16.msra.mxu0 %v2280_v40 }
 0x47c   : > { %v2349_v60 = vpop.eup %2348 }
 0x47d   : > { %v1194_v62 = vmul.f32 %v2349_v60, %v2345_v49  ;;  %v1267_v63 = vpop.permute.xlu1 %1266 }
 0x47e   : > { %2134 = vmatmul.msk.bf16.vlgmr.msra.gmra.mxu1 %vm1129_vm11, %v1267_v63  ;;  %1418 = vmatpush.bf16.msra.mxu0 %v2279_v46 }
 0x47f   : > { %v1196_v0 = vpack.c.bf16 %v1194_v62, %v1194_v62 }
 0x481   : > { %2131 = vmatmul.msk.bf16.vlgmr.msrb.gmra.mxu2 %vm1173_vm12, %v1196_v0  ;;  %2133 = vmatmul.msk.bf16.vlgmr.msrb.gmra.mxu0 %vm1129_vm11, %v1241_v1 }
 0x4ee   : > { %v2722_v2 = vpop.f32.mrf.mxu0 }
 0x4f6   : > { %v1235_v3 = vpop.f32.mrf.mxu0 }
 0x4fb   : > { %v1285_v4 = vpop.f32.mrf.mxu1 }
 0x4fc   : > { %v1292_v5 = vsel %vm1173_vm12, %v1285_v4, -inf }
 0x4fd   : > { %1293 = vmax.xlane.f32.xlu1 %v1292_v5 }
 0x4fe   : > { %v1259_v6 = vpop.f32.mrf.mxu0 }
 0x4ff   : > { %v1289_v7 = vsel %vm1173_vm12, %v1259_v6, -inf }
 0x500   : > { %1290 = vmax.xlane.f32.xlu0 %v1289_v7 }
 0x503   : > { %v1287_v8 = vpop.f32.mrf.mxu1 }
 0x504   : > { %v1214_v9 = vpop.f32.mrf.mxu2 }
 0x506   : > { %v1261_v10 = vpop.f32.mrf.mxu0 }
 0x507   : > { %v2290_v10 = vld [vmem:[%s2558_s5 + $0x34] sm:$0xf0] }
 0x50c   : > { %v1216_v11 = vpop.f32.mrf.mxu2 }
 0x50d   : > { %v2289_v11 = vld [vmem:[%s2558_s5 + $0x34] sm:$0xf] }
 0x514   : > { %1340 = vrot.lane.b32.xlu0 %v1339_v13, %s2394_s25  ;;  %v2182_v13 = vld [vmem:[%s2558_s5 + $0x38] sm:$0xf0] }
 0x570   : > { %v1294_v14 = vpop.xlane.xlu1 %1293 }
 0x571   : > { %v1296_v15 = vsub.f32 %v1285_v4, %v1294_v14  ;;  %v2185_v14 = vor.u32 %v2289_v11, %v2182_v13  ;;  %v2302_v11 = vld [vmem:[%s2569_s16 + $0x58] sm:$0xff]  ;;  %v2301_v13 = vld [vmem:[%s2569_s16 + $0x50] sm:$0xff] }
 0x573   : > { %v1299_v16 = vmul.f32 1.442695, %v1296_v15  ;;  %v1291_v17 = vpop.xlane.xlu0 %1290  ;;  %v2172_v15 = vld [vmem:[%s2558_s5 + $0x20] sm:$0xf] }
 0x574   : > { %v1295_v18 = vsub.f32 %v1259_v6, %v1291_v17  ;;  %v2287_v17 = vld [vmem:[%s2558_s5 + $0x24] sm:$0xf] }
 0x575   : > { %2350 = vpow2.f32 %v1299_v16  ;;  %v2288_v16 = vld [vmem:[%s2558_s5 + $0x24] sm:$0xf0] }
 0x576   : > { %v1297_v19 = vmul.f32 1.442695, %v1295_v18  ;;  %v2173_v18 = vor.u32 %v2288_v16, %v2172_v15  ;;  %v2291_v15 = vld [vmem:[%s2569_s16] sm:$0xff] }
 0x578   : > { %2352 = vpow2.f32 %v1297_v19  ;;  %v2174_v19 = vld [vmem:[%s2558_s5 + $0x28] sm:$0xf0] }
 0x57b   : > { %v2351_v20 = vpop.eup %2350 }
 0x57c   : > { %v1304_v22 = vsel %vm1173_vm12, %v2351_v20, 0.0 }
 0x57d   : > { %1305 = vadd.xlane.f32.xlu2 %v1304_v22  ;;  %v2164_v22 = vld [vmem:[%s2558_s5 + $0x10] sm:$0xf] }
 0x57e   : > { %v2353_v23 = vpop.eup %2352 }
 0x57f   : > { %v1301_v24 = vsel %vm1173_vm12, %v2353_v23, 0.0 }
 0x585   : > { %1302 = vadd.xlane.f32.xlu2 %v1301_v24  ;;  %v2285_v24 = vld [vmem:[%s2558_s5 + $0x14] sm:$0xf] }
 0x586   : > { %v1341_v21 = vpop.permute.xlu0 %1340 }
 0x587   : > { %v1346_v25 = vsel %vm1201_vm10, %v1341_v21, 0 }
 0x588   : > { %1355 = vmatpush.bf16.msrb.mxu3 %v1346_v25  ;;  %v2166_v25 = vld [vmem:[%s2558_s5 + $0x18] sm:$0xf0] }
 0x589   : > { %v2169_v26 = vor.u32 %v2285_v24, %v2166_v25 }
 0x59d   : > { %1316 = vrot.lane.b32.xlu2 %v1315_v28, %s2394_s25  ;;  %s2911_s25 = sld [smem:[#allocation15_spill]] (!%p2252_p5) }
 0x5f0   : > { %v1306_v29 = vpop.xlane.xlu2 %1305 }
 0x5f1   : > { %2354 = vrcp.f32 %v1306_v29 }
 0x5f7   : > { %v2355_v30 = vpop.eup %2354 }
 0x5f8   : > { %v1310_v31 = vmul.f32 %v2355_v30, %v2351_v20  ;;  %v1303_v32 = vpop.xlane.xlu2 %1302  ;;  %v2177_v20 = vor.u32 %v2287_v17, %v2174_v19  ;;  %v2156_v30 = vld [vmem:[%s2558_s5] sm:$0xf]  ;;  %v2300_v17 = vld [vmem:[%s2569_s16 + $0x48] sm:$0xff] }
 0x5f9   : > { %2356 = vrcp.f32 %v1303_v32  ;;  %v2283_v32 = vld [vmem:[%s2558_s5 + $0x4] sm:$0xf] }
 0x5fa   : > { %v1312_v33 = vpack.c.bf16 %v1310_v31, %v1310_v31  ;;  %v2284_v31 = vld [vmem:[%s2558_s5 + $0x4] sm:$0xf0] }
 0x5fc   : > { %2136 = vmatmul.msk.bf16.vlgmr.msrb.gmra.mxu3 %vm1173_vm12, %v1312_v33  ;;  %v2157_v33 = vor.u32 %v2284_v31, %v2156_v30 }
 0x5ff   : > { %v2357_v34 = vpop.eup %2356 }
 0x600   : > { %v1309_v35 = vmul.f32 %v2357_v34, %v2353_v23  ;;  %v1317_v36 = vpop.permute.xlu2 %1316  ;;  %v2286_v23 = vld [vmem:[%s2558_s5 + $0x14] sm:$0xf0]  ;;  %v2158_v34 = vld [vmem:[%s2558_s5 + $0x8] sm:$0xf0] }
 0x601   : > { %v1322_v27 = vsel %vm1201_vm10, %v1317_v36, 0  ;;  %v2165_v21 = vor.u32 %v2286_v23, %v2164_v22  ;;  %v2161_v36 = vor.u32 %v2283_v32, %v2158_v34 }
 0x602   : > { %v1311_v37 = vpack.c.bf16 %v1309_v35, %v1309_v35  ;;  %1331 = vmatpush.bf16.msra.mxu2 %v1322_v27 }
 0x605   : > { %2135 = vmatmul.msk.bf16.vlgmr.msra.gmra.mxu2 %vm1173_vm12, %v1311_v37 }
 0x606   : > { %1559 = vmatpush.bf16.msrb.mxu2 %v2185_v14  ;;  %v1492_v14 = vld [vmem:[%s2563_s3] sm:$0x3] }
 0x607   : > { %v1494_v16 = vperm.slane %v1492_v14, 0  ;;  %v1495_v23 = vperm.slane %v1492_v14, 1 }
 0x60a   : > { %1560 = vmatpush.bf16.msrb.mxu2 %v2177_v20  ;;  %v2299_v20 = vld [vmem:[%s2569_s16 + $0x40] sm:$0xff] }
 0x60e   : > { %1561 = vmatpush.bf16.msrb.mxu2 %v2169_v26 }
 0x612   : > { %1562 = vmatpush.bf16.msrb.mxu2 %v2161_v36 }
 0x67f   : > { %v1357_v41 = vpop.f32.mrf.mxu3 }
 0x687   : > { %v1359_v42 = vpop.f32.mrf.mxu3 }
 0x688   : > { %v1333_v43 = vpop.f32.mrf.mxu2 }
 0x689   : > { %v2325_v44 = vpack.i.bf16 %v1357_v41, %v1333_v43 }
 0x68b   : > { %2326 = vrot.lane.b32.xlu1 %v2325_v44, %s2392_s4 }
 0x690   : > { %v1335_v45 = vpop.f32.mrf.mxu2 }
 0x6fd   : > { %v2327_v47 = vpop.permute.xlu1 %2326 }
 0x6fe   : > { %v2329_v48 = vunpack.i.h.bf16 %v2327_v47  ;;  %v2328_v49 = vunpack.i.l.bf16 %v2327_v47 }
 0x700   : > { %v1370_v50 = vsel %vm1129_vm11, %v2722_v2, %v2329_v48  ;;  %v1369_v52 = vsel %vm1129_vm11, %v1214_v9, %v2328_v49  ;;  %v2180_v9 = vld [vmem:[%s2558_s5 + $0x30] sm:$0xf] }
 0x701   : > { %v1371_v54 = vpack.c.bf16 %v1370_v50, %v1369_v52  ;;  %v2181_v12 = vor.u32 %v2290_v10, %v2180_v9  ;;  %v2333_v52 = vld [vmem:[%s2908_s30] ss:$0 sm:$0xff]  ;;  %v2293_v10 = vld [vmem:[%s2569_s16 + $0x10] sm:$0xff] }
 0x702   : > { %v2303_v9 = vld [vmem:[%s2569_s16 + $0x60] sm:$0xff] }
 0x703   : > { %2153 = vmatmul.msk.bf16.vlgmr.msra.gmra.mxu0 %vm968_vm2, %v1371_v54  ;;  %1545 = vmatpush.bf16.msrb.mxu1 %v2181_v12  ;;  %v2292_v12 = vld [vmem:[%s2569_s16 + $0x8] sm:$0xff] }
 0x707   : > { %1546 = vmatpush.bf16.msrb.mxu1 %v2173_v18 }
 0x70b   : > { %1547 = vmatpush.bf16.msrb.mxu1 %v2165_v21 }
 0x70f   : > { %1548 = vmatpush.bf16.msrb.mxu1 %v2157_v33 }
 0x780   : > { %v1420_v56 = vpop.f32.mrf.mxu0 }
 0x781   : > { %v1421_v57 = vadd.f32 %v2332_v55, %v1420_v56 }
 0x783   : > { %v2751_v58 = vadd.f32 %v1421_v57, %v2639_v51  ;;  %v2334_v57 = vld [vmem:[%s777_s22] ss:$0 sm:$0xff] }
 0x785   : > { %v1429_v59 = vsel %vm968_vm2, %v2751_v58, 0.0 }
 0x786   : > { %1430 = vadd.xlane.f32.xlu2 %v1429_v59 }
 0x788   : > { %v1422_v60 = vpop.f32.mrf.mxu0 }
 0x789   : > { %v1423_v62 = vadd.f32 %v2332_v55, %v1422_v60 }
 0x78b   : > { %v2756_v63 = vadd.f32 %v1423_v62, %v2643_v53 }
 0x78d   : > { %v1432_v0 = vsel %vm968_vm2, %v2756_v63, 0.0 }
 0x78e   : > { %1433 = vadd.xlane.f32.xlu0 %v1432_v0 }
 0x7f9   : > { %v1431_v1 = vpop.xlane.xlu2 %1430 }
 0x7fa   : > { %v1435_v51 = vmul.f32 %v1431_v1, %v2647_v61 }
 0x7fc   : > { %v2762_v2 = vsub.f32 %v2751_v58, %v1435_v51 }
 0x7fe   : > { %v1439_v3 = vmul.f32 %v2762_v2, %v2762_v2 }
 0x800   : > { %v1441_v4 = vsel %vm968_vm2, %v1439_v3, 0.0  ;;  %v2297_v3 = vld [vmem:[%s2569_s16 + $0x30] sm:$0xff] }
 0x801   : > { %v1434_v53 = vpop.xlane.xlu0 %1433  ;;  %1442 = vadd.xlane.f32.xlu1 %v1441_v4  ;;  %v2306_v4 = vld [vmem:[%s2569_s16 + $0x78] sm:$0xff] }
 0x802   : > { %v1436_v5 = vmul.f32 %v1434_v53, %v2647_v61  ;;  %1753 = vmatpush.bf16.msrb.mxu0 %v2306_v4  ;;  %v2296_v53 = vld [vmem:[%s2569_s16 + $0x28] sm:$0xff] }
 0x804   : > { %v2769_v6 = vsub.f32 %v2756_v63, %v1436_v5  ;;  %v2305_v5 = vld [vmem:[%s2569_s16 + $0x70] sm:$0xff] }
 0x806   : > { %v1440_v7 = vmul.f32 %v2769_v6, %v2769_v6  ;;  %1754 = vmatpush.bf16.msrb.mxu0 %v2305_v5  ;;  %v2335_v5 = vld [vmem:[%s794_s6] ss:$0 sm:$0xff] }
 0x808   : > { %v1444_v8 = vsel %vm968_vm2, %v1440_v7, 0.0  ;;  %v2304_v7 = vld [vmem:[%s2569_s16 + $0x68] sm:$0xff] }
 0x809   : > { %1445 = vadd.xlane.f32.xlu2 %v1444_v8  ;;  %v2294_v8 = vld [vmem:[%s2569_s16 + $0x18] sm:$0xff] }
 0x80a   : > { %1755 = vmatpush.bf16.msrb.mxu0 %v2304_v7 }
 0x80e   : > { %1756 = vmatpush.bf16.msrb.mxu0 %v2303_v9 }
 0x812   : > { %1757 = vmatpush.bf16.msrb.mxu0 %v2302_v11 }
 0x816   : > { %1758 = vmatpush.bf16.msrb.mxu0 %v2301_v13 }
 0x81a   : > { %1759 = vmatpush.bf16.msrb.mxu0 %v2300_v17 }
 0x81e   : > { %1760 = vmatpush.bf16.msrb.mxu0 %v2299_v20 }
 0x874   : > { %v1443_v28 = vpop.xlane.xlu1 %1442 }
 0x875   : > { %v1447_v29 = vmul.f32 %v1443_v28, %v2647_v61 }
 0x877   : > { %v1449_v35 = vadd.f32 1e-05, %v1447_v29 }
 0x879   : > { %2358 = vrsqrt.f32 %v1449_v35  ;;  %vm1457_vm14 = vweird.f32 %v1449_v35 }
 0x87c   : > { %v1446_v27 = vpop.xlane.xlu2 %1445 }
 0x87d   : > { %v1448_v37 = vmul.f32 %v1446_v27, %v2647_v61 }
 0x87f   : > { %v2359_v38 = vpop.eup %2358  ;;  %v1450_v39 = vadd.f32 1e-05, %v1448_v37 }
 0x880   : > { %v1452_v40 = vmul.f32 %v2359_v38, %v1449_v35  ;;  %vm1458_vm13 = vweird.f32 %v2359_v38 }
 0x881   : > { %2360 = vrsqrt.f32 %v1450_v39  ;;  %vm1459_vm15 = vmor %vm1457_vm14, %vm1458_vm13  ;;  %vm1467_vm1 = vweird.f32 %v1450_v39 }
 0x882   : > { %v1453_v41 = vmul.f32 %v2359_v38, %v1452_v40 }
 0x884   : > { %v1454_v42 = vmul.f32 0.5, %v1453_v41 }
 0x886   : > { %v1455_v43 = vsub.f32 1.5, %v1454_v42 }
 0x887   : > { %v2361_v44 = vpop.eup %2360 }
 0x888   : > { %v1456_v45 = vmul.f32 %v2359_v38, %v1455_v43  ;;  %v1462_v46 = vmul.f32 %v2361_v44, %v1450_v39  ;;  %vm1468_vm0 = vweird.f32 %v2361_v44 }
 0x889   : > { %vm1469_vm3 = vmor %vm1467_vm1, %vm1468_vm0 }
 0x88a   : > { %v1463_v47 = vmul.f32 %v2361_v44, %v1462_v46  ;;  %v1460_v48 = vsel %vm1459_vm15, %v2359_v38, %v1456_v45 }
 0x88b   : > { %v1471_v54 = vmul.f32 %v1460_v48, %v2762_v2  ;;  %v2298_v2 = vld [vmem:[%s2569_s16 + $0x38] sm:$0xff] }
 0x88c   : > { %v1464_v49 = vmul.f32 0.5, %v1463_v47  ;;  %1739 = vmatpush.bf16.msra.mxu3 %v2298_v2 }
 0x88d   : > { %v1476_v59 = vmul.f32 %v2333_v52, %v1471_v54 }
 0x88e   : > { %v1465_v50 = vsub.f32 1.5, %v1464_v49 }
 0x88f   : > { %v1481_v0 = vadd.f32 %v2334_v57, %v1476_v59 }
 0x890   : > { %v1466_v55 = vmul.f32 %v2361_v44, %v1465_v50  ;;  %1740 = vmatpush.bf16.msra.mxu3 %v2297_v3 }
 0x892   : > { %v1470_v56 = vsel %vm1469_vm3, %v2361_v44, %v1466_v55 }
 0x893   : > { %v1472_v60 = vmul.f32 %v1470_v56, %v2769_v6  ;;  %v2295_v6 = vld [vmem:[%s2569_s16 + $0x20] sm:$0xff]  ;;  %s2909_s16 = sld [smem:[#allocation13_spill]] (!%p2252_p5) }
 0x894   : > { %1741 = vmatpush.bf16.msra.mxu3 %v2296_v53 }
 0x895   : > { %v1477_v62 = vmul.f32 %v2333_v52, %v1472_v60 }
 0x897   : > { %v1482_v1 = vadd.f32 %v2334_v57, %v1477_v62 }
 0x898   : > { %1742 = vmatpush.bf16.msra.mxu3 %v2295_v6 }
 0x899   : > { %v1483_v51 = vpack.c.bf16 %v1482_v1, %v1481_v0 }
 0x89b   : > { %2186 = vmatmul.msk.bf16.vlgmr.msrb.gmra.mxu1 %vm968_vm2, %v1483_v51  ;;  %2187 = vmatmul.msk.bf16.vlgmr.msrb.gmra.mxu2 %vm968_vm2, %v1483_v51 }
 0x89c   : > { %1743 = vmatpush.bf16.msra.mxu3 %v2294_v8 }
 0x8a0   : > { %1744 = vmatpush.bf16.msra.mxu3 %v2293_v10 }
 0x8a4   : > { %1745 = vmatpush.bf16.msra.mxu3 %v2292_v12 }
 0x8a8   : > { %1746 = vmatpush.bf16.msra.mxu3 %v2291_v15 }
 0x918   : > { %v1550_v18 = vpop.f32.mrf.mxu1 }
 0x919   : > { %v1551_v19 = vadd.f32 %v1550_v18, %v1494_v16 }
 0x91b   : > { %v1573_v22 = vmul.f32 0.044715, %v1551_v19  ;;  %v1569_v52 = vmul.f32 0.5, %v1551_v19 }
 0x91d   : > { %v1577_v24 = vmul.f32 %v1573_v22, %v1551_v19 }
 0x91e   : > { %v1564_v21 = vpop.f32.mrf.mxu2 }
 0x91f   : > { %v1581_v25 = vmul.f32 %v1577_v24, %v1551_v19  ;;  %v1565_v26 = vadd.f32 %v1564_v21, %v1495_v23 }
 0x920   : > { %v1552_v28 = vpop.f32.mrf.mxu1 }
 0x921   : > { %v1585_v29 = vadd.f32 %v1581_v25, %v1551_v19  ;;  %v1574_v30 = vmul.f32 0.044715, %v1565_v26  ;;  %v1553_v31 = vadd.f32 %v1552_v28, %v1494_v16  ;;  %v1570_v1 = vmul.f32 0.5, %v1565_v26 }
 0x923   : > { %v1578_v32 = vmul.f32 %v1574_v30, %v1565_v26  ;;  %v1575_v33 = vmul.f32 0.044715, %v1553_v31  ;;  %v1589_v34 = vmul.f32 0.7978846, %v1585_v29  ;;  %v1571_v54 = vmul.f32 0.5, %v1553_v31 }
 0x925   : > { %v1582_v35 = vmul.f32 %v1578_v32, %v1565_v26  ;;  %v1579_v36 = vmul.f32 %v1575_v33, %v1553_v31  ;;  %2362 = vtanh.f32 %v1589_v34 }
 0x926   : > { %v1566_v27 = vpop.f32.mrf.mxu2 }
 0x927   : > { %v1586_v37 = vadd.f32 %v1582_v35, %v1565_v26  ;;  %v1583_v38 = vmul.f32 %v1579_v36, %v1553_v31  ;;  %v1567_v39 = vadd.f32 %v1566_v27, %v1495_v23 }
 0x929   : > { %v1587_v40 = vadd.f32 %v1583_v38, %v1553_v31  ;;  %v1576_v41 = vmul.f32 0.044715, %v1567_v39  ;;  %v1590_v42 = vmul.f32 0.7978846, %v1586_v37  ;;  %v1572_v51 = vmul.f32 0.5, %v1567_v39 }
 0x92b   : > { %v1591_v43 = vmul.f32 0.7978846, %v1587_v40  ;;  %v1580_v44 = vmul.f32 %v1576_v41, %v1567_v39  ;;  %v2363_v46 = vpop.eup %2362 }
 0x92c   : > { %v1597_v49 = vadd.f32 1.0, %v2363_v46 }
 0x92d   : > { %v1584_v45 = vmul.f32 %v1580_v44, %v1567_v39  ;;  %2364 = vtanh.f32 %v1591_v43 }
 0x92e   : > { %2366 = vtanh.f32 %v1590_v42  ;;  %v1601_v57 = vmul.f32 %v1597_v49, %v1569_v52 }
 0x92f   : > { %v1588_v47 = vadd.f32 %v1584_v45, %v1567_v39 }
 0x931   : > { %v1592_v48 = vmul.f32 0.7978846, %v1588_v47 }
 0x933   : > { %v2365_v50 = vpop.eup %2364  ;;  %2368 = vtanh.f32 %v1592_v48 }
 0x934   : > { %v1599_v55 = vadd.f32 1.0, %v2365_v50  ;;  %v2367_v56 = vpop.eup %2366 }
 0x935   : > { %v1598_v62 = vadd.f32 1.0, %v2367_v56 }
 0x936   : > { %v1603_v59 = vmul.f32 %v1599_v55, %v1571_v54 }
 0x937   : > { %v1602_v3 = vmul.f32 %v1598_v62, %v1570_v1 }
 0x938   : > { %v1605_v60 = vpack.c.bf16 %v1603_v59, %v1601_v57 }
 0x939   : > { %v2369_v0 = vpop.eup %2368 }
 0x93a   : > { %1747 = vmatmul.bf16.vlgmr.msra.gmra.mxu3 %v1605_v60  ;;  %v1600_v2 = vadd.f32 1.0, %v2369_v0 }
 0x93c   : > { %v1604_v4 = vmul.f32 %v1600_v2, %v1572_v51 }
 0x93e   : > { %v1606_v53 = vpack.c.bf16 %v1604_v4, %v1602_v3 }
 0x940   : > { %1761 = vmatmul.bf16.vlgmr.msrb.gmra.mxu0 %v1606_v53 }
 0x9bd   : > { %v1748_v6 = vpop.f32.mrf.mxu3  ;;  %v1762_v7 = vpop.f32.mrf.mxu0 }
 0x9be   : > { %v1749_v8 = vadd.f32 %v2335_v5, %v1748_v6 }
 0x9c0   : > { %v1763_v9 = vadd.f32 %v1762_v7, %v1749_v8 }
 0x9c2   : > { %v1767_v10 = vadd.f32 %v1763_v9, %v2751_v58 }
 0x9c4   : > { %1769 = vst.msk [vmem:[#allocation2] sm:$0xff] %vm968_vm2, %v1767_v10 }
 0x9c5   : > { %v1750_v11 = vpop.f32.mrf.mxu3  ;;  %v1764_v13 = vpop.f32.mrf.mxu0 }
 0x9c6   : > { %v1751_v12 = vadd.f32 %v2335_v5, %v1750_v11 }
 0x9c8   : > { %v1765_v14 = vadd.f32 %v1764_v13, %v1751_v12  ;;  %1774 = sbr.rel (%p2252_p5) target bundleno = 2953 (0xb89), region = 108 }
 0x9ca   : > { %v1768_v15 = vadd.f32 %v1765_v14, %v2756_v63 }
 0x9cc   : > { %1770 = vst.msk [vmem:[#allocation2 + $0x8] sm:$0xff] %vm968_vm2, %v1768_v15 }
 0x9cd   : > { %v1780_v16 = vsel %vm968_vm2, %v1768_v15, 0.0  ;;  %v1777_v17 = vsel %vm968_vm2, %v1767_v10, 0.0  ;;  %v2370_v40 = vld [vmem:[%s2909_s16] ss:$0 sm:$0xff]  ;;  %vm1856_vm10 = vcmask 1041409   ;;  %vm1859_vm11 = vcmask 517120  }
 0x9ce   : > { %1781 = vadd.xlane.f32.xlu0 %v1780_v16  ;;  %v2371_v43 = vld [vmem:[%s2910_s26] ss:$0 sm:$0xff]  ;;  %v2373_v14 = vld [vmem:[#allocation3] ss:$0 sm:$0xff]  ;;  %vm1887_vm13 = vcmask 1024  }
 0x9cf   : > { %v2372_v5 = vld [vmem:[%s2911_s25] ss:$0 sm:$0xff] }
 0x9d6   : > { %1778 = vadd.xlane.f32.xlu0 %v1777_v17 }
 0xa41   : > { %v1782_v58 = vpop.xlane.xlu0 %1781 }
 0xa42   : > { %v1784_v18 = vmul.f32 %v1782_v58, %v2647_v61 }
 0xa44   : > { %v1786_v19 = vsub.f32 %v1768_v15, %v1784_v18 }
 0xa46   : > { %v1788_v20 = vmul.f32 %v1786_v19, %v1786_v19 }
 0xa48   : > { %v1792_v22 = vsel %vm968_vm2, %v1788_v20, 0.0 }
 0xa49   : > { %1793 = vadd.xlane.f32.xlu1 %v1792_v22  ;;  %v1779_v63 = vpop.xlane.xlu0 %1778 }
 0xa4a   : > { %v1783_v23 = vmul.f32 %v1779_v63, %v2647_v61 }
 0xa4c   : > { %v1785_v24 = vsub.f32 %v1767_v10, %v1783_v23 }
 0xa4e   : > { %v1787_v21 = vmul.f32 %v1785_v24, %v1785_v24 }
 0xa50   : > { %v1789_v25 = vsel %vm968_vm2, %v1787_v21, 0.0 }
 0xa51   : > { %1790 = vadd.xlane.f32.xlu1 %v1789_v25 }
 0xabc   : > { %v1794_v26 = vpop.xlane.xlu1 %1793 }
 0xabd   : > { %v1796_v28 = vmul.f32 %v1794_v26, %v2647_v61 }
 0xabf   : > { %v1798_v29 = vadd.f32 1e-05, %v1796_v28 }
 0xac1   : > { %2374 = vrsqrt.f32 %v1798_v29  ;;  %vm1815_vm5 = vweird.f32 %v1798_v29 }
 0xac4   : > { %v1791_v30 = vpop.xlane.xlu1 %1790 }
 0xac5   : > { %v1795_v31 = vmul.f32 %v1791_v30, %v2647_v61 }
 0xac7   : > { %v2375_v32 = vpop.eup %2374  ;;  %v1797_v33 = vadd.f32 1e-05, %v1795_v31 }
 0xac8   : > { %v1810_v34 = vmul.f32 %v2375_v32, %v1798_v29  ;;  %vm1816_vm4 = vweird.f32 %v2375_v32 }
 0xac9   : > { %2376 = vrsqrt.f32 %v1797_v33  ;;  %vm1817_vm6 = vmor %vm1815_vm5, %vm1816_vm4  ;;  %vm1805_vm8 = vweird.f32 %v1797_v33 }
 0xaca   : > { %v1811_v35 = vmul.f32 %v2375_v32, %v1810_v34 }
 0xacc   : > { %v1812_v36 = vmul.f32 0.5, %v1811_v35 }
 0xace   : > { %v1813_v27 = vsub.f32 1.5, %v1812_v36 }
 0xacf   : > { %v2377_v37 = vpop.eup %2376 }
 0xad0   : > { %v1814_v38 = vmul.f32 %v2375_v32, %v1813_v27  ;;  %v1800_v39 = vmul.f32 %v2377_v37, %v1797_v33  ;;  %vm1806_vm7 = vweird.f32 %v2377_v37 }
 0xad1   : > { %vm1807_vm9 = vmor %vm1805_vm8, %vm1806_vm7 }
 0xad2   : > { %v1818_v41 = vsel %vm1817_vm6, %v2375_v32, %v1814_v38  ;;  %v1801_v42 = vmul.f32 %v2377_v37, %v1800_v39 }
 0xad3   : > { %v1820_v61 = vmul.f32 %v1818_v41, %v1786_v19 }
 0xad4   : > { %v1802_v44 = vmul.f32 0.5, %v1801_v42 }
 0xad5   : > { %v1825_v45 = vmul.f32 %v2370_v40, %v1820_v61 }
 0xad6   : > { %v1803_v46 = vsub.f32 1.5, %v1802_v44 }
 0xad7   : > { %v1830_v47 = vadd.f32 %v2371_v43, %v1825_v45 }
 0xad8   : > { %v1804_v48 = vmul.f32 %v2377_v37, %v1803_v46 }
 0xad9   : > { %v1838_v49 = vsel %vm968_vm2, %v1830_v47, 0.0 }
 0xada   : > { %v1808_v50 = vsel %vm1807_vm9, %v2377_v37, %v1804_v48  ;;  %v1839_v52 = vrot.slane %v1838_v49, 4 }
 0xadb   : > { %v1819_v54 = vmul.f32 %v1808_v50, %v1785_v24 }
 0xadc   : > { %v1840_v55 = vadd.f32 %v1839_v52, %v1838_v49 }
 0xadd   : > { %v1824_v56 = vmul.f32 %v2370_v40, %v1819_v54 }
 0xade   : > { %v1841_v57 = vrot.slane %v1840_v55, 2 }
 0xadf   : > { %v1829_v59 = vadd.f32 %v2371_v43, %v1824_v56 }
 0xae0   : > { %v1842_v60 = vadd.f32 %v1841_v57, %v1840_v55 }
 0xae1   : > { %v1831_v62 = vsel %vm968_vm2, %v1829_v59, 0.0 }
 0xae2   : > { %v1832_v0 = vrot.slane %v1831_v62, 4  ;;  %v1843_v1 = vrot.slane %v1842_v60, 1 }
 0xae4   : > { %v1833_v51 = vadd.f32 %v1832_v0, %v1831_v62  ;;  %v1844_v2 = vadd.f32 %v1843_v1, %v1842_v60 }
 0xae6   : > { %v1834_v3 = vrot.slane %v1833_v51, 2  ;;  %v1846_v53 = vmul.f32 0.125, %v1844_v2 }
 0xae8   : > { %v1835_v4 = vadd.f32 %v1834_v3, %v1833_v51  ;;  %v1852_v8 = vmul.f32 %v2372_v5, %v1846_v53 }
 0xaea   : > { %v1836_v6 = vrot.slane %v1835_v4, 1  ;;  %v1855_v11 = vrot.slane %v1852_v8, 7 }
 0xaec   : > { %v1837_v7 = vadd.f32 %v1836_v6, %v1835_v4 }
 0xaee   : > { %v1845_v9 = vmul.f32 0.125, %v1837_v7 }
 0xaf0   : > { %v1851_v10 = vmul.f32 %v2372_v5, %v1845_v9 }
 0xaf2   : > { %v1857_v12 = vsel %vm1856_vm10, %v1855_v11, %v1851_v10 }
 0xaf3   : > { %v1860_v13 = vsel %vm1859_vm11, %v1857_v12, 0.0 }
 0xaf4   : > { %1861 = vadd.xlane.f32.xlu2 %v1860_v13 }
 0xb67   : > { %v1862_v15 = vpop.xlane.xlu2 %1861 }
 0xb68   : > { %v1867_v16 = vadd.f32 %v2373_v14, %v1862_v15 }
 0xb6a   : > { %v1868_v17 = vsub.f32 0.0, %v1867_v16 }
 0xb6c   : > { %v1869_v58 = vmul.f32 1.442695, %v1868_v17 }
 0xb6e   : > { %2378 = vpow2.f32 %v1869_v58 }
 0xb74   : > { %v2379_v18 = vpop.eup %2378 }
 0xb75   : > { %v1871_v19 = vadd.f32 1.0, %v2379_v18 }
 0xb77   : > { %2380 = vrcp.f32 %v1871_v19  ;;  %v1883_v23 = vand.u32 2147483648, %v1871_v19  ;;  %v1881_v21 = vand.u32 2147483647, %v1871_v19  ;;  %vm1877_vm12 = vweird.f32 %v1871_v19 }
 0xb79   : > { %v1884_v26 = vor.u32 1.1754944e-38, %v1883_v23  ;;  %vm1882_vm15 = vcmp.eq.f32.partialorder %v1881_v21, 8.507059e+37 }
 0xb7d   : > { %v2381_v20 = vpop.eup %2380 }
 0xb7e   : > { %v1873_v22 = vmul.f32 %v2381_v20, %v1871_v19  ;;  %vm1878_vm2 = vweird.f32 %v2381_v20 }
 0xb7f   : > { %vm1879_vm14 = vmor %vm1877_vm12, %vm1878_vm2 }
 0xb80   : > { %v1874_v63 = vsub.f32 1.0, %v1873_v22 }
 0xb82   : > { %v1875_v24 = vmul.f32 %v2381_v20, %v1874_v63 }
 0xb84   : > { %v1876_v25 = vadd.f32 %v2381_v20, %v1875_v24 }
 0xb86   : > { %v1880_v28 = vsel %vm1879_vm14, %v2381_v20, %v1876_v25 }
 0xb87   : > { %v1885_v29 = vsel %vm1882_vm15, %v1884_v26, %v1880_v28 }
 0xb88   : > { %1888 = vst.msk [vmem:[%s2878_s20] sm:$0x3] %vm1887_vm13, %v1885_v29 }
 0xb89 PF: > { %s2912_s2 = sld [smem:[#allocation4_spill]] }
 0xb8f   : > { %s32_s23 = sadd.s32 1, %s2912_s2  }
 0xb90   : > { %p29_p6 = scmp.ge.s32.totalorder %s32_s23, 4  }
 0xb92   :  { %31 = sbr.rel (!%p29_p6) target bundleno = 12 (0xc), region = 167 }

</bundles_post_ra>
